<compile_context>
chip_gen: v6e
topology: v6e:2x2x1
jax: 0.10.0
libtpu: 0.0.40
codegen_flags: <defaults>
</compile_context>

<pallas_src>
import jax
import jax.numpy as jnp
from jax.experimental import pallas as pl
from jax.experimental.pallas import tpu as pltpu


# ----------------------------- model dims ----------------------------------
AUDIO_LATENT_DIM = 128          # module default is 512; small-shape run
IMAGE_LATENT_DIM = 128
CONDITION_DIM = 3
COND_PAD = 8                    # condition zero-padded 3 -> 8 lanes
HIDDEN_COND = 128               # condition_net hidden width (fixed in module)
HIDDEN_NET = 512                # net hidden width (fixed in module)
BATCH = 8

# packed-bias lane offsets (all multiples of 128)
_B_CB1 = 0
_B_CB2 = _B_CB1 + HIDDEN_COND                 # 128
_B_CB3 = _B_CB2 + HIDDEN_COND                 # 256
_B_NB1 = _B_CB3 + AUDIO_LATENT_DIM            # 384
_B_NB2 = _B_NB1 + HIDDEN_NET                  # 896
_B_NB3 = _B_NB2 + HIDDEN_NET                  # 1408
_B_NB4 = _B_NB3 + HIDDEN_NET                  # 1920
_B_END = _B_NB4 + 2 * IMAGE_LATENT_DIM        # 2176


# ------------------------------- kernel ------------------------------------
def mapping_kernel(
    z_ref,      # (B, A)            f32   z_audio
    c_ref,      # (B, COND_PAD)     f32   condition, zero padded past CONDITION_DIM
    cw1_ref,    # (COND_PAD, 128)   bf16
    cw23_ref,   # (128, 256)        bf16  [cw2 | cw3]
    nw1_ref,    # (2A, 512)         bf16  rows 0:A multiply z, rows A: multiply cond
    nw23_ref,   # (512, 1024)       bf16  [nw2 | nw3]
    nw4_ref,    # (512, 2I)         bf16  [nw4_mu | nw4_logvar]
    b_ref,      # (1, 2176)         f32   packed biases
    mu_ref,     # (B, I)            f32
    logvar_ref, # (B, I)            f32
):
    f32 = jnp.float32
    bf16 = jnp.bfloat16
    A = z_ref.shape[-1]
    I = mu_ref.shape[-1]

    # bias views (f32, lane-aligned static slices of the packed slab)
    cb1 = b_ref[:, _B_CB1:_B_CB2]
    cb2 = b_ref[:, _B_CB2:_B_CB3]
    cb3 = b_ref[:, _B_CB3:_B_NB1]
    nb1 = b_ref[:, _B_NB1:_B_NB2]
    nb2 = b_ref[:, _B_NB2:_B_NB3]
    nb3 = b_ref[:, _B_NB3:_B_NB4]
    nb4_mu = b_ref[:, _B_NB4:_B_NB4 + I]
    nb4_lv = b_ref[:, _B_NB4 + I:_B_END]

    # ---- condition_net: Linear(3,128) -> ReLU -> Linear(128,128) -> ReLU
    #      -> Linear(128, audio_latent_dim)
    h = jnp.dot(c_ref[...].astype(bf16), cw1_ref[...],
                preferred_element_type=f32) + cb1
    h = jnp.maximum(h, 0.0)
    h = jnp.dot(h.astype(bf16), cw23_ref[:, :HIDDEN_COND],
                preferred_element_type=f32) + cb2
    h = jnp.maximum(h, 0.0)
    cond = jnp.dot(h.astype(bf16), cw23_ref[:, HIDDEN_COND:],
                   preferred_element_type=f32) + cb3

    # ---- x = cat([z_audio, condition], -1); the first Linear of `net` is
    #      computed as a split dot over the two row-blocks of its weight,
    #      avoiding an explicit lane-dim concat: x @ W1 = z @ W1[:A] + cond @ W1[A:]
    h = (
        jnp.dot(z_ref[...].astype(bf16), nw1_ref[:A, :], preferred_element_type=f32)
        + jnp.dot(cond.astype(bf16), nw1_ref[A:, :], preferred_element_type=f32)
        + nb1
    )
    h = jnp.maximum(h, 0.0)
    h = jnp.dot(h.astype(bf16), nw23_ref[:, :HIDDEN_NET],
                preferred_element_type=f32) + nb2
    h = jnp.maximum(h, 0.0)
    h = jnp.dot(h.astype(bf16), nw23_ref[:, HIDDEN_NET:],
                preferred_element_type=f32) + nb3
    h = jnp.maximum(h, 0.0)

    # ---- final Linear + chunk(2, dim=-1): two dots written straight to the
    #      output refs (full-tile unmasked stores, no fused intermediate).
    h16 = h.astype(bf16)
    mu_ref[...] = jnp.dot(h16, nw4_ref[:, :I], preferred_element_type=f32) + nb4_mu
    logvar_ref[...] = jnp.dot(h16, nw4_ref[:, I:], preferred_element_type=f32) + nb4_lv
    # TODO(synk): torch forward prints NaN/Inf warnings; data-dependent host
    # prints have no in-kernel equivalent (returned values match semantics).


# ------------------------------ wrapper -------------------------------------
def mapping_network_forward(z_audio, condition, params):
    """z_audio: (B, AUDIO_LATENT_DIM) f32, condition: (B, CONDITION_DIM) f32."""
    B = z_audio.shape[0]

    # zero-pad condition 3 -> 8 lanes (cw1's pad rows are zero, so identical).
    c_pad = jnp.pad(condition.astype(jnp.float32),
                    ((0, 0), (0, COND_PAD - CONDITION_DIM)))

    vmem = pl.BlockSpec(memory_space=pltpu.MemorySpace.VMEM)
    inputs = (
        z_audio, c_pad,
        params["cw1"], params["cw23"],
        params["nw1"], params["nw23"], params["nw4"],
        params["biases"],
    )
    mu, logvar = pl.pallas_call(
        mapping_kernel,
        out_shape=(
            jax.ShapeDtypeStruct((B, IMAGE_LATENT_DIM), jnp.float32),
            jax.ShapeDtypeStruct((B, IMAGE_LATENT_DIM), jnp.float32),
        ),
        in_specs=[vmem] * len(inputs),
        out_specs=(vmem, vmem),
    )(*inputs)
    return mu, logvar


# ------------------------- deterministic params ------------------------------
def init_params(key):
    """PyTorch-style uniform(-1/sqrt(fan_in), 1/sqrt(fan_in)) init, stored as
    (in, out) matrices, packed into bf16 weight slabs + one f32 bias slab."""
    def linear(key, fan_in, fan_out, pad_in=None):
        kw, kb = jax.random.split(key)
        bound = 1.0 / jnp.sqrt(jnp.float32(fan_in))
        w = jax.random.uniform(kw, (fan_in, fan_out), jnp.float32, -bound, bound)
        b = jax.random.uniform(kb, (fan_out,), jnp.float32, -bound, bound)
        if pad_in is not None and pad_in > fan_in:
            w = jnp.pad(w, ((0, pad_in - fan_in), (0, 0)))
        return w, b

    keys = jax.random.split(key, 7)
    cw1, cb1 = linear(keys[0], CONDITION_DIM, HIDDEN_COND, pad_in=COND_PAD)
    cw2, cb2 = linear(keys[1], HIDDEN_COND, HIDDEN_COND)
    cw3, cb3 = linear(keys[2], HIDDEN_COND, AUDIO_LATENT_DIM)
    nw1, nb1 = linear(keys[3], 2 * AUDIO_LATENT_DIM, HIDDEN_NET)
    nw2, nb2 = linear(keys[4], HIDDEN_NET, HIDDEN_NET)
    nw3, nb3 = linear(keys[5], HIDDEN_NET, HIDDEN_NET)
    nw4, nb4 = linear(keys[6], HIDDEN_NET, 2 * IMAGE_LATENT_DIM)

    bf16 = jnp.bfloat16
    biases = jnp.concatenate([cb1, cb2, cb3, nb1, nb2, nb3, nb4]).reshape(1, -1)
    assert biases.shape[-1] == _B_END
    return {
        "cw1": cw1.astype(bf16),                                    # (8, 128)
        "cw23": jnp.concatenate([cw2, cw3], axis=1).astype(bf16),   # (128, 256)
        "nw1": nw1.astype(bf16),                                    # (256, 512)
        "nw23": jnp.concatenate([nw2, nw3], axis=1).astype(bf16),   # (512, 1024)
        "nw4": nw4.astype(bf16),                                    # (512, 256)
        "biases": biases.astype(jnp.float32),                       # (1, 2176)
    }


# ---------------------------- reference (JAX) --------------------------------
def reference_forward(z_audio, condition, params):
    """Same math (bf16 weights / bf16 dot operands, f32 accumulation)."""
    f32 = jnp.float32
    bf16 = jnp.bfloat16
    b = params["biases"]
    cb1, cb2, cb3 = b[:, _B_CB1:_B_CB2], b[:, _B_CB2:_B_CB3], b[:, _B_CB3:_B_NB1]
    nb1, nb2, nb3 = b[:, _B_NB1:_B_NB2], b[:, _B_NB2:_B_NB3], b[:, _B_NB3:_B_NB4]
    nb4 = b[:, _B_NB4:_B_END]

    c = jnp.pad(condition, ((0, 0), (0, COND_PAD - CONDITION_DIM))).astype(bf16)
    h = jax.nn.relu(jnp.dot(c, params["cw1"], preferred_element_type=f32) + cb1)
    h = jax.nn.relu(jnp.dot(h.astype(bf16), params["cw23"][:, :HIDDEN_COND],
                            preferred_element_type=f32) + cb2)
    cond = jnp.dot(h.astype(bf16), params["cw23"][:, HIDDEN_COND:],
                   preferred_element_type=f32) + cb3

    x = jnp.concatenate([z_audio, cond], axis=-1).astype(bf16)
    h = jax.nn.relu(jnp.dot(x, params["nw1"], preferred_element_type=f32) + nb1)
    h = jax.nn.relu(jnp.dot(h.astype(bf16), params["nw23"][:, :HIDDEN_NET],
                            preferred_element_type=f32) + nb2)
    h = jax.nn.relu(jnp.dot(h.astype(bf16), params["nw23"][:, HIDDEN_NET:],
                            preferred_element_type=f32) + nb3)
    out = jnp.dot(h.astype(bf16), params["nw4"], preferred_element_type=f32) + nb4
    return out[:, :IMAGE_LATENT_DIM], out[:, IMAGE_LATENT_DIM:]


if __name__ == "__main__":
    key = jax.random.PRNGKey(0)
    k_param, k_z, k_c = jax.random.split(key, 3)

    params = init_params(k_param)
    z_audio = jax.random.normal(k_z, (BATCH, AUDIO_LATENT_DIM), jnp.float32)
    condition = jax.random.normal(k_c, (BATCH, CONDITION_DIM), jnp.float32)

    mu, logvar = mapping_network_forward(z_audio, condition, params)
    jax.block_until_ready((mu, logvar))

    mu_ref, logvar_ref = reference_forward(z_audio, condition, params)
    assert mu.shape == (BATCH, IMAGE_LATENT_DIM)
    assert logvar.shape == (BATCH, IMAGE_LATENT_DIM)
    assert jnp.allclose(mu, mu_ref, atol=5e-3, rtol=5e-3)
    assert jnp.allclose(logvar, logvar_ref, atol=5e-3, rtol=5e-3)

    print("KERNEL_OK")
</pallas_src>

<mosaic_0001>
module attributes {stable_mosaic.version = 11 : i64} {
  func.func @mapping_kernel(%arg0: memref<8x128xf32, #tpu.memory_space<vmem>>, %arg1: memref<8x8xf32, #tpu.memory_space<vmem>>, %arg2: memref<8x128xbf16, #tpu.memory_space<vmem>>, %arg3: memref<128x256xbf16, #tpu.memory_space<vmem>>, %arg4: memref<256x512xbf16, #tpu.memory_space<vmem>>, %arg5: memref<512x1024xbf16, #tpu.memory_space<vmem>>, %arg6: memref<512x256xbf16, #tpu.memory_space<vmem>>, %arg7: memref<1x2176xf32, #tpu.memory_space<vmem>>, %arg8: memref<8x128xf32, #tpu.memory_space<vmem>>, %arg9: memref<8x128xf32, #tpu.memory_space<vmem>>) attributes {dimension_semantics = [], scalar_prefetch = 0 : i64, scratch_operands = 0 : i64, tpu.core_type = #tpu.core_type<tc>} {
    %c0 = arith.constant 0 : index
    %c0_0 = arith.constant 0 : index
    %0 = vector.load %arg7[%c0, %c0_0] : memref<1x2176xf32, #tpu.memory_space<vmem>>, vector<1x128xf32>
    %c0_1 = arith.constant 0 : index
    %c128 = arith.constant 128 : index
    %1 = vector.load %arg7[%c0_1, %c128] : memref<1x2176xf32, #tpu.memory_space<vmem>>, vector<1x128xf32>
    %c0_2 = arith.constant 0 : index
    %c256 = arith.constant 256 : index
    %2 = vector.load %arg7[%c0_2, %c256] : memref<1x2176xf32, #tpu.memory_space<vmem>>, vector<1x128xf32>
    %c0_3 = arith.constant 0 : index
    %c384 = arith.constant 384 : index
    %3 = vector.load %arg7[%c0_3, %c384] : memref<1x2176xf32, #tpu.memory_space<vmem>>, vector<1x512xf32>
    %c0_4 = arith.constant 0 : index
    %c896 = arith.constant 896 : index
    %4 = vector.load %arg7[%c0_4, %c896] : memref<1x2176xf32, #tpu.memory_space<vmem>>, vector<1x512xf32>
    %c0_5 = arith.constant 0 : index
    %c1408 = arith.constant 1408 : index
    %5 = vector.load %arg7[%c0_5, %c1408] : memref<1x2176xf32, #tpu.memory_space<vmem>>, vector<1x512xf32>
    %c0_6 = arith.constant 0 : index
    %c1920 = arith.constant 1920 : index
    %6 = vector.load %arg7[%c0_6, %c1920] : memref<1x2176xf32, #tpu.memory_space<vmem>>, vector<1x128xf32>
    %c0_7 = arith.constant 0 : index
    %c2048 = arith.constant 2048 : index
    %7 = vector.load %arg7[%c0_7, %c2048] : memref<1x2176xf32, #tpu.memory_space<vmem>>, vector<1x128xf32>
    %c0_8 = arith.constant 0 : index
    %c0_9 = arith.constant 0 : index
    %8 = vector.load %arg1[%c0_8, %c0_9] : memref<8x8xf32, #tpu.memory_space<vmem>>, vector<8x8xf32>
    %9 = arith.truncf %8 : vector<8x8xf32> to vector<8x8xbf16>
    %c0_10 = arith.constant 0 : index
    %c0_11 = arith.constant 0 : index
    %10 = vector.load %arg2[%c0_10, %c0_11] : memref<8x128xbf16, #tpu.memory_space<vmem>>, vector<8x128xbf16>
    %cst = arith.constant dense<0.000000e+00> : vector<8x128xf32>
    %11 = tpu.matmul %9, %10, %cst {dimension_numbers = #tpu.dot_dimension_numbers<[1], [0], [0], [1], [0, 0, 1, 1], [], []>} : vector<8x8xbf16>, vector<8x128xbf16>, vector<8x128xf32> -> vector<8x128xf32>
    %12 = vector.broadcast %0 : vector<1x128xf32> to vector<8x128xf32>
    %13 = arith.addf %11, %12 : vector<8x128xf32>
    %cst_12 = arith.constant 0.000000e+00 : f32
    %14 = vector.broadcast %cst_12 : f32 to vector<8x128xf32>
    %15 = arith.maximumf %13, %14 : vector<8x128xf32>
    %16 = arith.truncf %15 : vector<8x128xf32> to vector<8x128xbf16>
    %c0_13 = arith.constant 0 : index
    %c0_14 = arith.constant 0 : index
    %17 = vector.load %arg3[%c0_13, %c0_14] : memref<128x256xbf16, #tpu.memory_space<vmem>>, vector<128x128xbf16>
    %cst_15 = arith.constant dense<0.000000e+00> : vector<8x128xf32>
    %18 = tpu.matmul %16, %17, %cst_15 {dimension_numbers = #tpu.dot_dimension_numbers<[1], [0], [0], [1], [0, 0, 1, 1], [], []>} : vector<8x128xbf16>, vector<128x128xbf16>, vector<8x128xf32> -> vector<8x128xf32>
    %19 = vector.broadcast %1 : vector<1x128xf32> to vector<8x128xf32>
    %20 = arith.addf %18, %19 : vector<8x128xf32>
    %cst_16 = arith.constant 0.000000e+00 : f32
    %21 = vector.broadcast %cst_16 : f32 to vector<8x128xf32>
    %22 = arith.maximumf %20, %21 : vector<8x128xf32>
    %23 = arith.truncf %22 : vector<8x128xf32> to vector<8x128xbf16>
    %c0_17 = arith.constant 0 : index
    %c128_18 = arith.constant 128 : index
    %24 = vector.load %arg3[%c0_17, %c128_18] : memref<128x256xbf16, #tpu.memory_space<vmem>>, vector<128x128xbf16>
    %cst_19 = arith.constant dense<0.000000e+00> : vector<8x128xf32>
    %25 = tpu.matmul %23, %24, %cst_19 {dimension_numbers = #tpu.dot_dimension_numbers<[1], [0], [0], [1], [0, 0, 1, 1], [], []>} : vector<8x128xbf16>, vector<128x128xbf16>, vector<8x128xf32> -> vector<8x128xf32>
    %26 = vector.broadcast %2 : vector<1x128xf32> to vector<8x128xf32>
    %27 = arith.addf %25, %26 : vector<8x128xf32>
    %c0_20 = arith.constant 0 : index
    %c0_21 = arith.constant 0 : index
    %28 = vector.load %arg0[%c0_20, %c0_21] : memref<8x128xf32, #tpu.memory_space<vmem>>, vector<8x128xf32>
    %29 = arith.truncf %28 : vector<8x128xf32> to vector<8x128xbf16>
    %c0_22 = arith.constant 0 : index
    %c0_23 = arith.constant 0 : index
    %30 = vector.load %arg4[%c0_22, %c0_23] : memref<256x512xbf16, #tpu.memory_space<vmem>>, vector<128x512xbf16>
    %cst_24 = arith.constant dense<0.000000e+00> : vector<8x512xf32>
    %31 = tpu.matmul %29, %30, %cst_24 {dimension_numbers = #tpu.dot_dimension_numbers<[1], [0], [0], [1], [0, 0, 1, 1], [], []>} : vector<8x128xbf16>, vector<128x512xbf16>, vector<8x512xf32> -> vector<8x512xf32>
    %32 = arith.truncf %27 : vector<8x128xf32> to vector<8x128xbf16>
    %c128_25 = arith.constant 128 : index
    %c0_26 = arith.constant 0 : index
    %33 = vector.load %arg4[%c128_25, %c0_26] : memref<256x512xbf16, #tpu.memory_space<vmem>>, vector<128x512xbf16>
    %cst_27 = arith.constant dense<0.000000e+00> : vector<8x512xf32>
    %34 = tpu.matmul %32, %33, %cst_27 {dimension_numbers = #tpu.dot_dimension_numbers<[1], [0], [0], [1], [0, 0, 1, 1], [], []>} : vector<8x128xbf16>, vector<128x512xbf16>, vector<8x512xf32> -> vector<8x512xf32>
    %35 = arith.addf %31, %34 : vector<8x512xf32>
    %36 = vector.broadcast %3 : vector<1x512xf32> to vector<8x512xf32>
    %37 = arith.addf %35, %36 : vector<8x512xf32>
    %cst_28 = arith.constant 0.000000e+00 : f32
    %38 = vector.broadcast %cst_28 : f32 to vector<8x512xf32>
    %39 = arith.maximumf %37, %38 : vector<8x512xf32>
    %40 = arith.truncf %39 : vector<8x512xf32> to vector<8x512xbf16>
    %c0_29 = arith.constant 0 : index
    %c0_30 = arith.constant 0 : index
    %41 = vector.load %arg5[%c0_29, %c0_30] : memref<512x1024xbf16, #tpu.memory_space<vmem>>, vector<512x512xbf16>
    %cst_31 = arith.constant dense<0.000000e+00> : vector<8x512xf32>
    %42 = tpu.matmul %40, %41, %cst_31 {dimension_numbers = #tpu.dot_dimension_numbers<[1], [0], [0], [1], [0, 0, 1, 1], [], []>} : vector<8x512xbf16>, vector<512x512xbf16>, vector<8x512xf32> -> vector<8x512xf32>
    %43 = vector.broadcast %4 : vector<1x512xf32> to vector<8x512xf32>
    %44 = arith.addf %42, %43 : vector<8x512xf32>
    %cst_32 = arith.constant 0.000000e+00 : f32
    %45 = vector.broadcast %cst_32 : f32 to vector<8x512xf32>
    %46 = arith.maximumf %44, %45 : vector<8x512xf32>
    %47 = arith.truncf %46 : vector<8x512xf32> to vector<8x512xbf16>
    %c0_33 = arith.constant 0 : index
    %c512 = arith.constant 512 : index
    %48 = vector.load %arg5[%c0_33, %c512] : memref<512x1024xbf16, #tpu.memory_space<vmem>>, vector<512x512xbf16>
    %cst_34 = arith.constant dense<0.000000e+00> : vector<8x512xf32>
    %49 = tpu.matmul %47, %48, %cst_34 {dimension_numbers = #tpu.dot_dimension_numbers<[1], [0], [0], [1], [0, 0, 1, 1], [], []>} : vector<8x512xbf16>, vector<512x512xbf16>, vector<8x512xf32> -> vector<8x512xf32>
    %50 = vector.broadcast %5 : vector<1x512xf32> to vector<8x512xf32>
    %51 = arith.addf %49, %50 : vector<8x512xf32>
    %cst_35 = arith.constant 0.000000e+00 : f32
    %52 = vector.broadcast %cst_35 : f32 to vector<8x512xf32>
    %53 = arith.maximumf %51, %52 : vector<8x512xf32>
    %54 = arith.truncf %53 : vector<8x512xf32> to vector<8x512xbf16>
    %c0_36 = arith.constant 0 : index
    %c0_37 = arith.constant 0 : index
    %55 = vector.load %arg6[%c0_36, %c0_37] : memref<512x256xbf16, #tpu.memory_space<vmem>>, vector<512x128xbf16>
    %cst_38 = arith.constant dense<0.000000e+00> : vector<8x128xf32>
    %56 = tpu.matmul %54, %55, %cst_38 {dimension_numbers = #tpu.dot_dimension_numbers<[1], [0], [0], [1], [0, 0, 1, 1], [], []>} : vector<8x512xbf16>, vector<512x128xbf16>, vector<8x128xf32> -> vector<8x128xf32>
    %57 = vector.broadcast %6 : vector<1x128xf32> to vector<8x128xf32>
    %58 = arith.addf %56, %57 : vector<8x128xf32>
    %c0_39 = arith.constant 0 : index
    %c0_40 = arith.constant 0 : index
    %59 = vector.load %arg8[%c0_39, %c0_40] : memref<8x128xf32, #tpu.memory_space<vmem>>, vector<8x128xf32>
    tpu.vector_store %arg8[%c0_39, %c0_40], %58 {strides = array<i32>} : memref<8x128xf32, #tpu.memory_space<vmem>>, vector<8x128xf32>,
    %c0_41 = arith.constant 0 : index
    %c128_42 = arith.constant 128 : index
    %60 = vector.load %arg6[%c0_41, %c128_42] : memref<512x256xbf16, #tpu.memory_space<vmem>>, vector<512x128xbf16>
    %cst_43 = arith.constant dense<0.000000e+00> : vector<8x128xf32>
    %61 = tpu.matmul %54, %60, %cst_43 {dimension_numbers = #tpu.dot_dimension_numbers<[1], [0], [0], [1], [0, 0, 1, 1], [], []>} : vector<8x512xbf16>, vector<512x128xbf16>, vector<8x128xf32> -> vector<8x128xf32>
    %62 = vector.broadcast %7 : vector<1x128xf32> to vector<8x128xf32>
    %63 = arith.addf %61, %62 : vector<8x128xf32>
    %c0_44 = arith.constant 0 : index
    %c0_45 = arith.constant 0 : index
    %64 = vector.load %arg9[%c0_44, %c0_45] : memref<8x128xf32, #tpu.memory_space<vmem>>, vector<8x128xf32>
    tpu.vector_store %arg9[%c0_44, %c0_45], %63 {strides = array<i32>} : memref<8x128xf32, #tpu.memory_space<vmem>>, vector<8x128xf32>,
    return
  }
}

</mosaic_0001>

<bundles_post_ra>
// kernel: tpu_custom_call.1
= control target key start
LH: loop header
LB: loop body
LE: loop exit
PB: predicated region body
PF: predicated region fallthrough
CT: control target
= control target key end

     0   :  { %15 = vsyncpa [#allocation3], 0  ;;  %s4826_s0 = inlined_call_operand.hbm [shape: f32[8,128], index: 0, kind: input, shape index: {}]   ;;  %s4827_s1 = inlined_call_operand.hbm [shape: f32[8,8], index: 1, kind: input, shape index: {}]   ;;  %s4828_s2 = inlined_call_operand.hbm [shape: bf16[8,128], index: 2, kind: input, shape index: {}]   ;;  %s4829_s3 = inlined_call_operand.hbm [shape: bf16[128,256], index: 3, kind: input, shape index: {}]   ;;  %s4830_s4 = inlined_call_operand.hbm [shape: bf16[256,512], index: 4, kind: input, shape index: {}]   ;;  %s4831_s5 = inlined_call_operand.hbm [shape: bf16[512,1024], index: 5, kind: input, shape index: {}]   ;;  %s4832_s6 = inlined_call_operand.hbm [shape: bf16[512,256], index: 6, kind: input, shape index: {}]   ;;  %s4833_s7 = inlined_call_operand.hbm [shape: f32[1,2176], index: 7, kind: input, shape index: {}]   ;;  %s4834_s8 = inlined_call_operand.hbm [shape: f32[8,128], index: 8, kind: output, shape index: {0}]   ;;  %s4835_s9 = inlined_call_operand.hbm [shape: f32[8,128], index: 9, kind: output, shape index: {1}]  }
   0x1   :  { %16 = vsyncpa [#allocation6], 0 }
   0x2   :  { %17 = vsyncpa [#allocation9], 0 }
   0x3   :  { %18 = vsyncpa [#allocation12], 0 }
   0x4   :  { %19 = vsyncpa [#allocation15], 0 }
   0x5   :  { %20 = vsyncpa [#allocation4], 0 }
   0x6   :  { %21 = vsyncpa [#allocation18], 0  ;;  %s4618_s30 = smov [#allocation5]   ;;  %s4619_s11 = smov [#allocation8]  }
   0x7   :  { %s38_s10 = sshll.u32 %s4618_s30, 4  ;;  %s57_s12 = sshll.u32 %s4619_s11, 4  ;;  %s39_s10 = int_to_ptr.vmem [resolvable:$true] %s38_s10  ;;  %s58_s12 = int_to_ptr.vmem [resolvable:$true] %s57_s12 }
   0x8   :  { %s4412_s13 = scalar_lea.vmem %s39_s10, 128  ;;  %p4417_p1 = scmp.lt.s32.totalorder %s39_s10, %s39_s10 }
   0x9   :  { %p4413_p0 = scmp.ne.s32.totalorder %s39_s10, %s4412_s13  ;;  %p4418_p2 = scmp.lt.s32.totalorder %s4412_s13, %s4412_s13 }
   0xb   :  { %p4419_p3 = por %p4418_p2, %p4417_p1 }
   0xd   :  { %p4420_p4 = pnand %p4419_p3, %p4413_p0 }
   0xf   :  { %4423 = shalt.err (!%p4420_p4)
}
  0x10   :  { %41 = dma.hbm_to_vmem [thread:$0]  %s4827_s1, 128, %s39_s10, [#allocation6]  }
  0x11   :  { %s4432_s16 = scalar_lea.vmem %s58_s12, 2048  ;;  %p4437_p6 = scmp.lt.s32.totalorder %s58_s12, %s58_s12 }
  0x12   :  { %p4433_p5 = scmp.ne.s32.totalorder %s58_s12, %s4432_s16  ;;  %p4438_p7 = scmp.lt.s32.totalorder %s4432_s16, %s4432_s16 }
  0x14   :  { %p4439_p8 = por %p4438_p7, %p4437_p6 }
  0x16   :  { %p4440_p9 = pnand %p4439_p8, %p4433_p5 }
  0x18   :  { %4443 = shalt.err (!%p4440_p9)
}
  0x19   :  { %s4620_s17 = smov 128   ;;  %s4621_s18 = smov 8  }
  0x1a   :  { %63 = dma.hbm_to_vmem [thread:$0]  %s4829_s3, 2048, %s58_s12, [#allocation9], %s4620_s17, %s4620_s17, %s4621_s18  }
  0x1b   :  { %s4622_s21 = smov [#allocation11]  }
  0x1c   :  { %s81_s22 = sshll.u32 %s4622_s21, 4  ;;  %s82_s22 = int_to_ptr.vmem [resolvable:$true] %s81_s22 }
  0x1d   :  { %s4452_s1 = scalar_lea.vmem %s82_s22, 32768  ;;  %p4457_p11 = scmp.lt.s32.totalorder %s82_s22, %s82_s22 }
  0x1e   :  { %p4453_p10 = scmp.ne.s32.totalorder %s82_s22, %s4452_s1  ;;  %p4458_p12 = scmp.lt.s32.totalorder %s4452_s1, %s4452_s1 }
  0x20   :  { %p4459_p13 = por %p4458_p12, %p4457_p11 }
  0x22   :  { %p4460_p0 = pnand %p4459_p13, %p4453_p10 }
  0x24   :  { %4463 = shalt.err (!%p4460_p0)
}
  0x25   :  { %s4623_s23 = smov 512   ;;  %s4624_s24 = smov 32  }
  0x26   :  { %87 = dma.hbm_to_vmem [thread:$0]  %s4831_s5, 32768, %s82_s22, [#allocation12], %s4623_s23, %s4623_s23, %s4624_s24  }
  0x27   :  { %s4625_s27 = smov [#allocation2]   ;;  %s4626_s3 = smov [#allocation7]  }
  0x28   :  { %s28_s28 = sshll.u32 %s4625_s27, 4  ;;  %s48_s29 = sshll.u32 %s4626_s3, 4  ;;  %s29_s28 = int_to_ptr.vmem [resolvable:$true] %s28_s28  ;;  %s49_s29 = int_to_ptr.vmem [resolvable:$true] %s48_s29 }
  0x29   :  { %s4472_s30 = scalar_lea.vmem %s29_s28, 128  ;;  %p4477_p2 = scmp.lt.s32.totalorder %s29_s28, %s29_s28 }
  0x2a   :  { %p4473_p1 = scmp.ne.s32.totalorder %s29_s28, %s4472_s30  ;;  %p4478_p3 = scmp.lt.s32.totalorder %s4472_s30, %s4472_s30 }
  0x2c   :  { %p4479_p4 = por %p4478_p3, %p4477_p2 }
  0x2e   :  { %p4480_p5 = pnand %p4479_p4, %p4473_p1 }
  0x30   :  { %4483 = shalt.err (!%p4480_p5)
}
  0x31   :  { %31 = dma.hbm_to_vmem [thread:$0]  %s4826_s0, 128, %s29_s28, [#allocation3]  }
  0x32   :  { %s4492_s12 = scalar_lea.vmem %s49_s29, 64  ;;  %p4497_p7 = scmp.lt.s32.totalorder %s49_s29, %s49_s29 }
  0x33   :  { %p4493_p6 = scmp.ne.s32.totalorder %s49_s29, %s4492_s12  ;;  %p4498_p8 = scmp.lt.s32.totalorder %s4492_s12, %s4492_s12 }
  0x35   :  { %p4499_p9 = por %p4498_p8, %p4497_p7 }
  0x37   :  { %p4500_p10 = pnand %p4499_p9, %p4493_p6 }
  0x39   :  { %4503 = shalt.err (!%p4500_p10)
}
  0x3a   :  { %51 = dma.hbm_to_vmem [thread:$0]  %s4828_s2, 64, %s49_s29, [#allocation6]  }
  0x3b   :  { %s4627_s14 = smov [#allocation10]  }
  0x3c   :  { %s69_s15 = sshll.u32 %s4627_s14, 4  ;;  %s70_s15 = int_to_ptr.vmem [resolvable:$true] %s69_s15 }
  0x3d   :  { %s4512_s16 = scalar_lea.vmem %s70_s15, 8192  ;;  %p4517_p12 = scmp.lt.s32.totalorder %s70_s15, %s70_s15 }
  0x3e   :  { %p4513_p11 = scmp.ne.s32.totalorder %s70_s15, %s4512_s16  ;;  %p4518_p13 = scmp.lt.s32.totalorder %s4512_s16, %s4512_s16 }
  0x40   :  { %p4519_p0 = por %p4518_p13, %p4517_p12 }
  0x42   :  { %p4520_p1 = pnand %p4519_p0, %p4513_p11 }
  0x44   :  { %4523 = shalt.err (!%p4520_p1)
}
  0x45   :  { %s4628_s0 = smov 256   ;;  %s4629_s19 = smov 16  }
  0x46   :  { %75 = dma.hbm_to_vmem [thread:$0]  %s4830_s4, 8192, %s70_s15, [#allocation9], %s4628_s0, %s4628_s0, %s4629_s19  }
  0x47   :  { %s4630_s22 = smov [#allocation13]   ;;  %s4631_s23 = smov [#allocation14]  }
  0x48   :  { %s93_s1 = sshll.u32 %s4630_s22, 4  ;;  %s106_s2 = sshll.u32 %s4631_s23, 4  ;;  %s94_s1 = int_to_ptr.vmem [resolvable:$true] %s93_s1  ;;  %s107_s2 = int_to_ptr.vmem [resolvable:$true] %s106_s2 }
  0x49   :  { %s4532_s24 = scalar_lea.vmem %s94_s1, 8192  ;;  %p4537_p3 = scmp.lt.s32.totalorder %s94_s1, %s94_s1 }
  0x4a   :  { %p4533_p2 = scmp.ne.s32.totalorder %s94_s1, %s4532_s24  ;;  %p4538_p4 = scmp.lt.s32.totalorder %s4532_s24, %s4532_s24 }
  0x4c   :  { %p4539_p5 = por %p4538_p4, %p4537_p3 }
  0x4e   :  { %p4540_p6 = pnand %p4539_p5, %p4533_p2 }
  0x50   :  { %4543 = shalt.err (!%p4540_p6)
}
  0x51   :  { %99 = dma.hbm_to_vmem [thread:$0]  %s4832_s6, 8192, %s94_s1, [#allocation12], %s4620_s17, %s4620_s17, %s4621_s18  }
  0x52   :  { %s4552_s4 = scalar_lea.vmem %s107_s2, 272  ;;  %s4556_s27 = scalar_lea.vmem %s107_s2, 288 }
  0x53   :  { %p4553_p7 = scmp.ne.s32.totalorder %s107_s2, %s4552_s4  ;;  %p4557_p8 = scmp.lt.s32.totalorder %s107_s2, %s107_s2 }
  0x54   :  { %p4558_p9 = scmp.lt.s32.totalorder %s4556_s27, %s4552_s4 }
  0x56   :  { %p4559_p10 = por %p4558_p9, %p4557_p8 }
  0x58   :  { %p4560_p11 = pnand %p4559_p10, %p4553_p7 }
  0x5a   :  { %4563 = shalt.err (!%p4560_p11)
}
  0x5b   :  { %109 = dma.hbm_to_vmem [thread:$0]  %s4833_s7, 272, %s107_s2, [#allocation15]  }
  0x5c   :  { %4604 = dma.done.wait [#allocation3], 128  }
  0x5d   :  { %4605 = vsyncadd [#allocation3], 4294967168 }
  0x5e   :  { %4606 = dma.done.wait [#allocation6], 192  }
  0x5f   :  { %4607 = vsyncadd [#allocation6], 4294967104 }
  0x60   :  { %4608 = dma.done.wait [#allocation9], 10240  }
  0x61   :  { %4609 = vsyncadd [#allocation9], 4294957056 }
  0x62   :  { %4610 = dma.done.wait [#allocation12], 40960  }
  0x63   :  { %4611 = vsyncadd [#allocation12], 4294926336 }
  0x64   :  { %4612 = dma.done.wait [#allocation15], 272  }
  0x65   :  { %4613 = vsyncadd [#allocation15], 4294967024  ;;  %v4632_v0 = vmov 0.0   ;;  %vm4633_vm0 = vmmov 0   ;;  %vm156_vm1 = vcmask 1043456   ;;  %v143_v2 = vld [vmem:[#allocation5] sm:$0xff] }
  0x66   :  { %4163 = vmatprep.subr.bf16.mxu0 %v4632_v0  ;;  %4165 = vmatprep.mubr.msk.bf16.mxu0 %vm4633_vm0, %v4632_v0  ;;  %v145_v1 = vld [vmem:[#allocation7] sm:$0xf]  ;;  %v144_v4 = vpack.c.bf16 %v143_v2, %v143_v2  ;;  %v4228_v5 = vld [vmem:[#allocation8 + $0x70] ss:$8 sps:$4 sm:$0xff]   ;;  %vm152_vm2 = vcmask 64512   ;;  %s4635_s6 = smov [#allocation16]  }
  0x67   :  { %4169 = vmatprep.subr.bf16.mxu1 %v4632_v0  ;;  %4185 = vmatprep.mubr.msk.bf16.mxu1 %vm4633_vm0, %v4632_v0  ;;  %v158_v3 = vsel %vm156_vm1, %v145_v1, 0  ;;  %v4229_v6 = vld [vmem:[#allocation8 + $0x60] ss:$8 sps:$4 sm:$0xff]   ;;  %v4230_v7 = vld [vmem:[#allocation8 + $0x50] ss:$8 sps:$4 sm:$0xff]   ;;  %s3622_s7 = sshll.u32 %s4635_s6, 4  ;;  %s3623_s7 = int_to_ptr.vmem [resolvable:$true] %s3622_s7 }
  0x68   :  { %4164 = vmatpush3.bf16.msra.mxu0 %v158_v3  ;;  %4170 = vmatpush3.bf16.msra.mxu1 %v4228_v5  ;;  %v4231_v8 = vld [vmem:[#allocation8 + $0x40] ss:$8 sps:$4 sm:$0xff]   ;;  %v4232_v9 = vld [vmem:[#allocation8 + $0x30] ss:$8 sps:$4 sm:$0xff]   ;;  %v4236_v13 = vld [vmem:[#allocation8 + $0x74] ss:$8 sps:$4 sm:$0xff]   ;;  %p4569_p13 = scmp.lt.s32.totalorder %s3623_s7, %s3623_s7 }
  0x69   :  { %4189 = vmatprep.subr.bf16.mxu0 %v4632_v0  ;;  %4171 = vmatprep.subr.bf16.mxu1 %v4632_v0  ;;  %v4233_v10 = vld [vmem:[#allocation8 + $0x20] ss:$8 sps:$4 sm:$0xff]   ;;  %v4234_v11 = vld [vmem:[#allocation8 + $0x10] ss:$8 sps:$4 sm:$0xff]   ;;  %v4237_v14 = vld [vmem:[#allocation8 + $0x64] ss:$8 sps:$4 sm:$0xff]  }
  0x6a   :  { %v4235_v12 = vld [vmem:[#allocation8] ss:$8 sps:$4 sm:$0xff]   ;;  %v4238_v15 = vld [vmem:[#allocation8 + $0x54] ss:$8 sps:$4 sm:$0xff]   ;;  %v4239_v16 = vld [vmem:[#allocation8 + $0x44] ss:$8 sps:$4 sm:$0xff]  }
  0x6b   :  { %4166 = vmatmul.mubr.msk.bf16.vlgmr.msra.gmra.mxu0 %vm152_vm2, %v144_v4  ;;  %v4240_v17 = vld [vmem:[#allocation8 + $0x34] ss:$8 sps:$4 sm:$0xff]   ;;  %v4241_v18 = vld [vmem:[#allocation8 + $0x24] ss:$8 sps:$4 sm:$0xff]   ;;  %v3649_v19 = vld [vmem:[#allocation14] ss:$0 sm:$0xff] }
  0x6c   :  { %4205 = vmatprep.mubr.msk.bf16.mxu0 %vm4633_vm0, %v4632_v0  ;;  %4172 = vmatpush3.bf16.msra.mxu1 %v4229_v6  ;;  %v4242_v27 = vld [vmem:[#allocation8 + $0x14] ss:$8 sps:$4 sm:$0xff]   ;;  %v4243_v28 = vld [vmem:[#allocation8 + $0x4] ss:$8 sps:$4 sm:$0xff]   ;;  %v4244_v29 = vld [vmem:[#allocation10 + $0x1e0] ss:$16 sps:$4 sm:$0xff]  }
  0x6d   :  { %4173 = vmatprep.subr.bf16.mxu1 %v4632_v0  ;;  %4190 = vmatpush3.bf16.msra.mxu0 %v4236_v13  ;;  %v4246_v30 = vld [vmem:[#allocation10 + $0x1e4] ss:$16 sps:$4 sm:$0xff]   ;;  %v4249_v31 = vld [vmem:[#allocation10 + $0x1ec] ss:$16 sps:$4 sm:$0xff]   ;;  %v4250_v33 = vld [vmem:[#allocation10 + $0x1c0] ss:$16 sps:$4 sm:$0xff]  }
  0x6e   :  { %4191 = vmatprep.subr.bf16.mxu0 %v4632_v0  ;;  %v4252_v32 = vld [vmem:[#allocation10 + $0x1c4] ss:$16 sps:$4 sm:$0xff]   ;;  %v4256_v35 = vld [vmem:[#allocation10 + $0x1a0] ss:$16 sps:$4 sm:$0xff]   ;;  %v4247_v50 = vld [vmem:[#allocation10 + $0x1e8] ss:$16 sps:$4 sm:$0xff]  }
  0x6f   :  { %v4258_v34 = vld [vmem:[#allocation10 + $0x1a4] ss:$16 sps:$4 sm:$0xff]   ;;  %v4262_v37 = vld [vmem:[#allocation10 + $0x180] ss:$16 sps:$4 sm:$0xff]   ;;  %v4255_v52 = vld [vmem:[#allocation10 + $0x1cc] ss:$16 sps:$4 sm:$0xff]  }
  0x70   :  { %4174 = vmatpush3.bf16.msra.mxu1 %v4230_v7  ;;  %v4264_v36 = vld [vmem:[#allocation10 + $0x184] ss:$16 sps:$4 sm:$0xff]   ;;  %v4268_v39 = vld [vmem:[#allocation10 + $0x160] ss:$16 sps:$4 sm:$0xff]   ;;  %v4253_v54 = vld [vmem:[#allocation10 + $0x1c8] ss:$16 sps:$4 sm:$0xff]  }
  0x71   :  { %4175 = vmatprep.subr.bf16.mxu1 %v4632_v0  ;;  %4192 = vmatpush3.bf16.msra.mxu0 %v4237_v14  ;;  %v4270_v38 = vld [vmem:[#allocation10 + $0x164] ss:$16 sps:$4 sm:$0xff]   ;;  %v4274_v41 = vld [vmem:[#allocation10 + $0x140] ss:$16 sps:$4 sm:$0xff]   ;;  %v4261_v55 = vld [vmem:[#allocation10 + $0x1ac] ss:$16 sps:$4 sm:$0xff]  }
  0x72   :  { %4193 = vmatprep.subr.bf16.mxu0 %v4632_v0  ;;  %v4276_v40 = vld [vmem:[#allocation10 + $0x144] ss:$16 sps:$4 sm:$0xff]   ;;  %v4280_v43 = vld [vmem:[#allocation10 + $0x120] ss:$16 sps:$4 sm:$0xff]   ;;  %v4259_v56 = vld [vmem:[#allocation10 + $0x1a8] ss:$16 sps:$4 sm:$0xff]  }
  0x73   :  { %v4282_v42 = vld [vmem:[#allocation10 + $0x124] ss:$16 sps:$4 sm:$0xff]   ;;  %v3651_v44 = vld [vmem:[#allocation14 + $0x1] ss:$0 sm:$0xff]  ;;  %v4267_v57 = vld [vmem:[#allocation10 + $0x18c] ss:$16 sps:$4 sm:$0xff]  }
  0x74   :  { %4176 = vmatpush3.bf16.msra.mxu1 %v4231_v8  ;;  %v4265_v58 = vld [vmem:[#allocation10 + $0x188] ss:$16 sps:$4 sm:$0xff]   ;;  %v4273_v59 = vld [vmem:[#allocation10 + $0x16c] ss:$16 sps:$4 sm:$0xff]   ;;  %v4288_v1 = vld [vmem:[#allocation10 + $0x104] ss:$16 sps:$4 sm:$0xff]  }
  0x75   :  { %4177 = vmatprep.subr.bf16.mxu1 %v4632_v0  ;;  %4194 = vmatpush3.bf16.msra.mxu0 %v4238_v15  ;;  %v4271_v60 = vld [vmem:[#allocation10 + $0x168] ss:$16 sps:$4 sm:$0xff]   ;;  %v4279_v61 = vld [vmem:[#allocation10 + $0x14c] ss:$16 sps:$4 sm:$0xff]   ;;  %v4286_v3 = vld [vmem:[#allocation10 + $0x100] ss:$16 sps:$4 sm:$0xff]  }
  0x76   :  { %4195 = vmatprep.subr.bf16.mxu0 %v4632_v0  ;;  %v4277_v62 = vld [vmem:[#allocation10 + $0x148] ss:$16 sps:$4 sm:$0xff]   ;;  %v4285_v63 = vld [vmem:[#allocation10 + $0x12c] ss:$16 sps:$4 sm:$0xff]   ;;  %v4294_v5 = vld [vmem:[#allocation10 + $0xe4] ss:$16 sps:$4 sm:$0xff]  }
  0x77   :  { %v4291_v2 = vld [vmem:[#allocation10 + $0x10c] ss:$16 sps:$4 sm:$0xff]   ;;  %v4289_v4 = vld [vmem:[#allocation10 + $0x108] ss:$16 sps:$4 sm:$0xff]   ;;  %v4634_v7 = vmov 0   ;;  %s4564_s17 = scalar_lea.vmem %s3623_s7, 128 }
  0x78   :  { %4178 = vmatpush3.bf16.msra.mxu1 %v4232_v9  ;;  %v4297_v6 = vld [vmem:[#allocation10 + $0xec] ss:$16 sps:$4 sm:$0xff]   ;;  %v3660_v8 = vld [vmem:[#allocation14 + $0x2] ss:$0 sm:$0xff]  ;;  %v4295_v13 = vld [vmem:[#allocation10 + $0xe8] ss:$16 sps:$4 sm:$0xff]   ;;  %p4565_p12 = scmp.ne.s32.totalorder %s3623_s7, %s4564_s17  ;;  %p4570_p0 = scmp.lt.s32.totalorder %s4564_s17, %s4564_s17 }
  0x79   :  { %4179 = vmatprep.subr.bf16.mxu1 %v4632_v0  ;;  %4196 = vmatpush3.bf16.msra.mxu0 %v4239_v16  ;;  %v4300_v15 = vld [vmem:[#allocation10 + $0xc4] ss:$16 sps:$4 sm:$0xff]   ;;  %v4303_v16 = vld [vmem:[#allocation10 + $0xcc] ss:$16 sps:$4 sm:$0xff]  }
  0x7a   :  { %4197 = vmatprep.subr.bf16.mxu0 %v4632_v0  ;;  %p4571_p1 = por %p4570_p0, %p4569_p13 }
  0x7c   :  { %4180 = vmatpush3.bf16.msra.mxu1 %v4233_v10  ;;  %p4572_p2 = pnand %p4571_p1, %p4565_p12 }
  0x7d   :  { %4181 = vmatprep.subr.bf16.mxu1 %v4632_v0  ;;  %4198 = vmatpush3.bf16.msra.mxu0 %v4240_v17 }
  0x7e   :  { %4199 = vmatprep.subr.bf16.mxu0 %v4632_v0 }
  0x80   :  { %4182 = vmatpush3.bf16.msra.mxu1 %v4234_v11 }
  0x81   :  { %4183 = vmatprep.subr.bf16.mxu1 %v4632_v0  ;;  %4200 = vmatpush3.bf16.msra.mxu0 %v4241_v18 }
  0x82   :  { %4201 = vmatprep.subr.bf16.mxu0 %v4632_v0 }
  0x84   :  { %4184 = vmatpush3.bf16.msra.mxu1 %v4235_v12  ;;  %v4292_v12 = vld [vmem:[#allocation10 + $0xe0] ss:$16 sps:$4 sm:$0xff]  }
  0x85   :  { %4202 = vmatpush3.bf16.msra.mxu0 %v4242_v27  ;;  %651 = vmatprep.subr.bf16.mxu1 %v4246_v30  ;;  %v4310_v27 = vld [vmem:[#allocation10 + $0x80] ss:$16 sps:$4 sm:$0xff]   ;;  %v4321_v30 = vld [vmem:[#allocation10 + $0x6c] ss:$16 sps:$4 sm:$0xff]  }
  0x86   :  { %4203 = vmatprep.subr.bf16.mxu0 %v4632_v0  ;;  %v4283_v0 = vld [vmem:[#allocation10 + $0x128] ss:$16 sps:$4 sm:$0xff]  }
  0x89   :  { %4204 = vmatpush3.bf16.msra.mxu0 %v4243_v28  ;;  %v4313_v28 = vld [vmem:[#allocation10 + $0x88] ss:$16 sps:$4 sm:$0xff]  }
  0x8a   :  { %692 = vmatprep.subr.bf16.mxu0 %v4249_v31  ;;  %v4316_v31 = vld [vmem:[#allocation10 + $0x60] ss:$16 sps:$4 sm:$0xff]  }
 0x12b   :  { %v194_v20 = vpop.f32.mrf.mxu0 }
 0x12c   :  { %v195_v21 = vadd.f32 %v3649_v19, %v194_v20  ;;  %v4298_v19 = vld [vmem:[#allocation10 + $0xc0] ss:$16 sps:$4 sm:$0xff]   ;;  %v4301_v20 = vld [vmem:[#allocation10 + $0xc8] ss:$16 sps:$4 sm:$0xff]  }
 0x12d   :  { %v4167_v22 = vpop.f32.mrf.mxu0 }
 0x12e   :  { %v200_v23 = vmax.f32 %v195_v21, 0.0  ;;  %v4306_v21 = vld [vmem:[#allocation10 + $0xa4] ss:$16 sps:$4 sm:$0xff]   ;;  %v4309_v22 = vld [vmem:[#allocation10 + $0xac] ss:$16 sps:$4 sm:$0xff]  }
 0x12f   :  { %v197_v24 = vpop.f32.mrf.mxu0 }
 0x130   :  { %v201_v25 = vpack.c.bf16 %v200_v23, %v200_v23  ;;  %v4304_v23 = vld [vmem:[#allocation10 + $0xa0] ss:$16 sps:$4 sm:$0xff]   ;;  %v4307_v24 = vld [vmem:[#allocation10 + $0xa8] ss:$16 sps:$4 sm:$0xff]  }
 0x131   :  { %v4168_v26 = vpop.f32.mrf.mxu0 }
 0x132   :  { %4186 = vmatmul.mubr.bf16.vlgmr.msra.gmra.mxu1 %v201_v25  ;;  %v4312_v25 = vld [vmem:[#allocation10 + $0x84] ss:$16 sps:$4 sm:$0xff]   ;;  %v4315_v26 = vld [vmem:[#allocation10 + $0x8c] ss:$16 sps:$4 sm:$0xff]  }
 0x133   :  { %652 = vmatpush1.bf16.msra.mxu1 %v4244_v29  ;;  %683 = vmatprep.mubr.bf16.mxu1 %v4634_v7  ;;  %v4318_v29 = vld [vmem:[#allocation10 + $0x64] ss:$16 sps:$4 sm:$0xff]  }
 0x134   :  { %653 = vmatprep.subr.bf16.mxu1 %v4252_v32  ;;  %v4319_v32 = vld [vmem:[#allocation10 + $0x68] ss:$16 sps:$4 sm:$0xff]  }
 0x137   :  { %654 = vmatpush1.bf16.msra.mxu1 %v4250_v33  ;;  %v4324_v33 = vld [vmem:[#allocation10 + $0x44] ss:$16 sps:$4 sm:$0xff]  }
 0x138   :  { %655 = vmatprep.subr.bf16.mxu1 %v4258_v34  ;;  %v4327_v34 = vld [vmem:[#allocation10 + $0x4c] ss:$16 sps:$4 sm:$0xff]  }
 0x13b   :  { %656 = vmatpush1.bf16.msra.mxu1 %v4256_v35  ;;  %v4322_v35 = vld [vmem:[#allocation10 + $0x40] ss:$16 sps:$4 sm:$0xff]  }
 0x13c   :  { %657 = vmatprep.subr.bf16.mxu1 %v4264_v36  ;;  %v4325_v36 = vld [vmem:[#allocation10 + $0x48] ss:$16 sps:$4 sm:$0xff]  }
 0x13f   :  { %658 = vmatpush1.bf16.msra.mxu1 %v4262_v37  ;;  %v4330_v37 = vld [vmem:[#allocation10 + $0x24] ss:$16 sps:$4 sm:$0xff]  }
 0x140   :  { %659 = vmatprep.subr.bf16.mxu1 %v4270_v38  ;;  %v4333_v38 = vld [vmem:[#allocation10 + $0x2c] ss:$16 sps:$4 sm:$0xff]  }
 0x143   :  { %660 = vmatpush1.bf16.msra.mxu1 %v4268_v39  ;;  %v4328_v39 = vld [vmem:[#allocation10 + $0x20] ss:$16 sps:$4 sm:$0xff]  }
 0x144   :  { %661 = vmatprep.subr.bf16.mxu1 %v4276_v40  ;;  %v4331_v40 = vld [vmem:[#allocation10 + $0x28] ss:$16 sps:$4 sm:$0xff]  }
 0x147   :  { %662 = vmatpush1.bf16.msra.mxu1 %v4274_v41  ;;  %v4336_v41 = vld [vmem:[#allocation10 + $0x4] ss:$16 sps:$4 sm:$0xff]  }
 0x148   :  { %663 = vmatprep.subr.bf16.mxu1 %v4282_v42  ;;  %v4339_v42 = vld [vmem:[#allocation10 + $0xc] ss:$16 sps:$4 sm:$0xff]  }
 0x14b   :  { %664 = vmatpush1.bf16.msra.mxu1 %v4280_v43  ;;  %v1036_v43 = vld [vmem:[#allocation11 + $0x1c0] sm:$0xff] }
 0x14c   :  { %665 = vmatprep.subr.bf16.mxu1 %v4288_v1 }
 0x14f   :  { %666 = vmatpush1.bf16.msra.mxu1 %v4286_v3 }
 0x150   :  { %893 = vmatprep.subr.bf16.mxu1 %v4294_v5  ;;  %v1024_v5 = vld [vmem:[#allocation11 + $0x100] sm:$0xff] }
 0x1f2   :  { %v306_v45 = vpop.f32.mrf.mxu1 }
 0x1f3   :  { %v307_v46 = vadd.f32 %v3651_v44, %v306_v45  ;;  %v1038_v44 = vld [vmem:[#allocation11 + $0x1e0] sm:$0xff] }
 0x1f4   :  { %v4187_v47 = vpop.f32.mrf.mxu1  ;;  %v1100_v45 = vld [vmem:[#allocation11 + $0x5c0] sm:$0xff] }
 0x1f5   :  { %v312_v48 = vmax.f32 %v307_v46, 0.0  ;;  %v1102_v46 = vld [vmem:[#allocation11 + $0x5e0] sm:$0xff] }
 0x1f6   :  { %v309_v49 = vpop.f32.mrf.mxu1  ;;  %v4334_v47 = vld [vmem:[#allocation10] ss:$16 sps:$4 sm:$0xff]  }
 0x1f7   :  { %v313_v51 = vpack.c.bf16 %v312_v48, %v312_v48  ;;  %v4337_v48 = vld [vmem:[#allocation10 + $0x8] ss:$16 sps:$4 sm:$0xff]   ;;  %v424_v49 = vld [vmem:[#allocation2] sm:$0xff] }
 0x1f8   :  { %v4188_v53 = vpop.f32.mrf.mxu1 }
 0x1f9   :  { %4206 = vmatmul.mubr.bf16.vlgmr.msra.gmra.mxu0 %v313_v51  ;;  %v3826_v51 = vcombine.high %v1100_v45, %v1102_v46  ;;  %v1034_v53 = vld [vmem:[#allocation11 + $0x1a0] sm:$0xff] }
 0x1fa   :  { %693 = vmatpush1.bf16.msra.mxu0 %v4247_v50  ;;  %724 = vmatprep.mubr.bf16.mxu0 %v4634_v7  ;;  %v3762_v50 = vcombine.high %v1036_v43, %v1038_v44 }
 0x1fb   :  { %694 = vmatprep.subr.bf16.mxu0 %v4255_v52  ;;  %v1032_v52 = vld [vmem:[#allocation11 + $0x180] sm:$0xff] }
 0x1fc   :  { %v3757_v1 = vcombine.low %v1032_v52, %v1034_v53 }
 0x1fe   :  { %695 = vmatpush1.bf16.msra.mxu0 %v4253_v54  ;;  %v1096_v54 = vld [vmem:[#allocation11 + $0x580] sm:$0xff] }
 0x1ff   :  { %696 = vmatprep.subr.bf16.mxu0 %v4261_v55  ;;  %v1098_v55 = vld [vmem:[#allocation11 + $0x5a0] sm:$0xff] }
 0x202   :  { %697 = vmatpush1.bf16.msra.mxu0 %v4259_v56  ;;  %v425_v56 = vpack.c.bf16 %v424_v49, %v424_v49  ;;  %v1132_v49 = vld [vmem:[#allocation11 + $0x7c0] sm:$0xff] }
 0x203   :  { %698 = vmatprep.subr.bf16.mxu0 %v4267_v57  ;;  %v3761_v57 = vcombine.low %v1036_v43, %v1038_v44  ;;  %v1074_v43 = vld [vmem:[#allocation11 + $0x420] sm:$0xff] }
 0x206   :  { %699 = vmatpush1.bf16.msra.mxu0 %v4265_v58  ;;  %v3825_v58 = vcombine.low %v1100_v45, %v1102_v46 }
 0x207   :  { %700 = vmatprep.subr.bf16.mxu0 %v4273_v59  ;;  %v3758_v59 = vcombine.high %v1032_v52, %v1034_v53  ;;  %v1064_v52 = vld [vmem:[#allocation11 + $0x380] sm:$0xff] }
 0x208   :  { %v1066_v53 = vld [vmem:[#allocation11 + $0x3a0] sm:$0xff] }
 0x20a   :  { %701 = vmatpush1.bf16.msra.mxu0 %v4271_v60  ;;  %v3822_v60 = vcombine.high %v1096_v54, %v1098_v55 }
 0x20b   :  { %702 = vmatprep.subr.bf16.mxu0 %v4279_v61  ;;  %v1028_v61 = vld [vmem:[#allocation11 + $0x140] sm:$0xff] }
 0x20e   :  { %703 = vmatpush1.bf16.msra.mxu0 %v4277_v62  ;;  %v1030_v62 = vld [vmem:[#allocation11 + $0x160] sm:$0xff] }
 0x20f   :  { %704 = vmatprep.subr.bf16.mxu0 %v4285_v63  ;;  %v1092_v63 = vld [vmem:[#allocation11 + $0x540] sm:$0xff]  ;;  %v3754_v3 = vcombine.high %v1028_v61, %v1030_v62 }
 0x212   :  { %705 = vmatpush1.bf16.msra.mxu0 %v4283_v0  ;;  %v1094_v0 = vld [vmem:[#allocation11 + $0x560] sm:$0xff] }
 0x213   :  { %706 = vmatprep.subr.bf16.mxu0 %v4291_v2  ;;  %v3821_v2 = vcombine.low %v1096_v54, %v1098_v55 }
 0x216   :  { %707 = vmatpush1.bf16.msra.mxu0 %v4289_v4  ;;  %v3818_v4 = vcombine.high %v1092_v63, %v1094_v0 }
 0x217   :  { %934 = vmatprep.subr.bf16.mxu0 %v4297_v6  ;;  %v1026_v6 = vld [vmem:[#allocation11 + $0x120] sm:$0xff] }
 0x2b9   :  { %v418_v9 = vpop.f32.mrf.mxu0 }
 0x2ba   :  { %v419_v10 = vadd.f32 %v3660_v8, %v418_v9  ;;  %v1090_v8 = vld [vmem:[#allocation11 + $0x520] sm:$0xff]  ;;  %v3753_v9 = vcombine.low %v1028_v61, %v1030_v62 }
 0x2bb   :  { %v4207_v11 = vpop.f32.mrf.mxu0  ;;  %v1060_v61 = vld [vmem:[#allocation11 + $0x340] sm:$0xff] }
 0x2bc   :  { %v458_v14 = vpack.c.bf16 %v419_v10, %v419_v10  ;;  %v3817_v10 = vcombine.low %v1092_v63, %v1094_v0  ;;  %v3750_v11 = vcombine.high %v1024_v5, %v1026_v6  ;;  %v1062_v62 = vld [vmem:[#allocation11 + $0x360] sm:$0xff] }
 0x2bd   :  { %v421_v17 = vpop.f32.mrf.mxu0  ;;  %v1124_v63 = vld [vmem:[#allocation11 + $0x740] sm:$0xff] }
 0x2be   :  { %684 = vmatmul.mubr.bf16.vlgmr.msra.gmra.mxu1 %v458_v14  ;;  %725 = vmatmul.mubr.bf16.vlgmr.msra.gmra.mxu0 %v458_v14  ;;  %v1022_v14 = vld [vmem:[#allocation11 + $0xe0] sm:$0xff]  ;;  %v3749_v17 = vcombine.low %v1024_v5, %v1026_v6 }
 0x2bf   :  { %894 = vmatpush1.bf16.msra.mxu1 %v4292_v12  ;;  %935 = vmatpush1.bf16.msra.mxu0 %v4295_v13  ;;  %v4208_v18 = vpop.f32.mrf.mxu0  ;;  %v1020_v13 = vld [vmem:[#allocation11 + $0xc0] sm:$0xff] }
 0x2c0   :  { %895 = vmatprep.subr.bf16.mxu1 %v4300_v15  ;;  %936 = vmatprep.subr.bf16.mxu0 %v4303_v16  ;;  %v1084_v15 = vld [vmem:[#allocation11 + $0x4c0] sm:$0xff] }
 0x2c1   :  { %925 = vmatprep.mubr.bf16.mxu1 %v4634_v7  ;;  %966 = vmatprep.mubr.bf16.mxu0 %v4634_v7  ;;  %v1088_v7 = vld [vmem:[#allocation11 + $0x500] sm:$0xff] }
 0x2c2   :  { %v3814_v12 = vcombine.high %v1088_v7, %v1090_v8  ;;  %v1086_v16 = vld [vmem:[#allocation11 + $0x4e0] sm:$0xff]  ;;  %v3813_v18 = vcombine.low %v1088_v7, %v1090_v8 }
 0x2c3   :  { %896 = vmatpush1.bf16.msra.mxu1 %v4298_v19  ;;  %937 = vmatpush1.bf16.msra.mxu0 %v4301_v20  ;;  %v3746_v19 = vcombine.high %v1020_v13, %v1022_v14  ;;  %v3810_v20 = vcombine.high %v1084_v15, %v1086_v16  ;;  %v1126_v0 = vld [vmem:[#allocation11 + $0x760] sm:$0xff] }
 0x2c4   :  { %897 = vmatprep.subr.bf16.mxu1 %v4306_v21  ;;  %938 = vmatprep.subr.bf16.mxu0 %v4309_v22  ;;  %v1016_v21 = vld [vmem:[#allocation11 + $0x80] sm:$0xff] }
 0x2c5   :  { %v1018_v22 = vld [vmem:[#allocation11 + $0xa0] sm:$0xff] }
 0x2c6   :  { %v1056_v5 = vld [vmem:[#allocation11 + $0x300] sm:$0xff] }
 0x2c7   :  { %898 = vmatpush1.bf16.msra.mxu1 %v4304_v23  ;;  %939 = vmatpush1.bf16.msra.mxu0 %v4307_v24  ;;  %v1080_v23 = vld [vmem:[#allocation11 + $0x480] sm:$0xff] }
 0x2c8   :  { %899 = vmatprep.subr.bf16.mxu1 %v4312_v25  ;;  %940 = vmatprep.subr.bf16.mxu0 %v4315_v26  ;;  %v1082_v24 = vld [vmem:[#allocation11 + $0x4a0] sm:$0xff]  ;;  %v3745_v25 = vcombine.low %v1020_v13, %v1022_v14  ;;  %v3809_v26 = vcombine.low %v1084_v15, %v1086_v16 }
 0x2c9   :  { %v1058_v6 = vld [vmem:[#allocation11 + $0x320] sm:$0xff] }
 0x2ca   :  { %v1120_v7 = vld [vmem:[#allocation11 + $0x700] sm:$0xff] }
 0x2cb   :  { %900 = vmatpush1.bf16.msra.mxu1 %v4310_v27  ;;  %941 = vmatpush1.bf16.msra.mxu0 %v4313_v28  ;;  %v3742_v27 = vcombine.high %v1016_v21, %v1018_v22  ;;  %v3806_v28 = vcombine.high %v1080_v23, %v1082_v24  ;;  %v1122_v8 = vld [vmem:[#allocation11 + $0x720] sm:$0xff] }
 0x2cc   :  { %901 = vmatprep.subr.bf16.mxu1 %v4318_v29  ;;  %942 = vmatprep.subr.bf16.mxu0 %v4321_v30  ;;  %v3741_v29 = vcombine.low %v1016_v21, %v1018_v22  ;;  %v3805_v30 = vcombine.low %v1080_v23, %v1082_v24  ;;  %v1052_v13 = vld [vmem:[#allocation11 + $0x2c0] sm:$0xff] }
 0x2cd   :  { %v1054_v14 = vld [vmem:[#allocation11 + $0x2e0] sm:$0xff] }
 0x2ce   :  { %v1116_v15 = vld [vmem:[#allocation11 + $0x6c0] sm:$0xff] }
 0x2cf   :  { %902 = vmatpush1.bf16.msra.mxu1 %v4316_v31  ;;  %943 = vmatpush1.bf16.msra.mxu0 %v4319_v32  ;;  %v1012_v31 = vld [vmem:[#allocation11 + $0x40] sm:$0xff] }
 0x2d0   :  { %903 = vmatprep.subr.bf16.mxu1 %v4324_v33  ;;  %944 = vmatprep.subr.bf16.mxu0 %v4327_v34  ;;  %v1014_v32 = vld [vmem:[#allocation11 + $0x60] sm:$0xff] }
 0x2d1   :  { %v1076_v33 = vld [vmem:[#allocation11 + $0x440] sm:$0xff]  ;;  %v3738_v34 = vcombine.high %v1012_v31, %v1014_v32 }
 0x2d2   :  { %v1118_v16 = vld [vmem:[#allocation11 + $0x6e0] sm:$0xff] }
 0x2d3   :  { %904 = vmatpush1.bf16.msra.mxu1 %v4322_v35  ;;  %945 = vmatpush1.bf16.msra.mxu0 %v4325_v36  ;;  %v1078_v35 = vld [vmem:[#allocation11 + $0x460] sm:$0xff]  ;;  %v3737_v36 = vcombine.low %v1012_v31, %v1014_v32 }
 0x2d4   :  { %905 = vmatprep.subr.bf16.mxu1 %v4330_v37  ;;  %946 = vmatprep.subr.bf16.mxu0 %v4333_v38  ;;  %v3801_v37 = vcombine.low %v1076_v33, %v1078_v35  ;;  %v3802_v38 = vcombine.high %v1076_v33, %v1078_v35  ;;  %v1048_v21 = vld [vmem:[#allocation11 + $0x280] sm:$0xff] }
 0x2d5   :  { %v1050_v22 = vld [vmem:[#allocation11 + $0x2a0] sm:$0xff] }
 0x2d6   :  { %v1112_v23 = vld [vmem:[#allocation11 + $0x680] sm:$0xff] }
 0x2d7   :  { %906 = vmatpush1.bf16.msra.mxu1 %v4328_v39  ;;  %947 = vmatpush1.bf16.msra.mxu0 %v4331_v40  ;;  %v1008_v39 = vld [vmem:[#allocation11] sm:$0xff] }
 0x2d8   :  { %907 = vmatprep.subr.bf16.mxu1 %v4336_v41  ;;  %948 = vmatprep.subr.bf16.mxu0 %v4339_v42  ;;  %v1010_v40 = vld [vmem:[#allocation11 + $0x20] sm:$0xff] }
 0x2d9   :  { %v1072_v41 = vld [vmem:[#allocation11 + $0x400] sm:$0xff]  ;;  %v3734_v42 = vcombine.high %v1008_v39, %v1010_v40  ;;  %v3733_v44 = vcombine.low %v1008_v39, %v1010_v40 }
 0x2da   :  { %v3797_v45 = vcombine.low %v1072_v41, %v1074_v43  ;;  %v3798_v46 = vcombine.high %v1072_v41, %v1074_v43  ;;  %v1114_v24 = vld [vmem:[#allocation11 + $0x6a0] sm:$0xff] }
 0x2db   :  { %908 = vmatpush1.bf16.msra.mxu1 %v4334_v47  ;;  %949 = vmatpush1.bf16.msra.mxu0 %v4337_v48  ;;  %v1068_v47 = vld [vmem:[#allocation11 + $0x3c0] sm:$0xff] }
 0x2dc   :  { %1797 = vmatprep.subr.bf16.mxu1 %v3762_v50  ;;  %1838 = vmatprep.subr.bf16.mxu0 %v3826_v51  ;;  %v1070_v48 = vld [vmem:[#allocation11 + $0x3e0] sm:$0xff] }
 0x2dd   :  { %v3794_v50 = vcombine.high %v1068_v47, %v1070_v48  ;;  %v1134_v51 = vld [vmem:[#allocation11 + $0x7e0] sm:$0xff]  ;;  %v3793_v54 = vcombine.low %v1068_v47, %v1070_v48  ;;  %v4740_v47 = vld [vmem:[#allocation11 + $0x1c8] sm:$0xff] }
 0x2de   :  { %926 = vmatmul.mubr.bf16.vlgmr.msra.gmra.mxu1 %v425_v56  ;;  %967 = vmatmul.mubr.bf16.vlgmr.msra.gmra.mxu0 %v425_v56  ;;  %v3858_v55 = vcombine.high %v1132_v49, %v1134_v51  ;;  %v1128_v56 = vld [vmem:[#allocation11 + $0x780] sm:$0xff]  ;;  %v4742_v48 = vld [vmem:[#allocation11 + $0x1e8] sm:$0xff] }
 0x2df   :  { %1798 = vmatpush1.bf16.msra.mxu1 %v3761_v57  ;;  %1839 = vmatpush1.bf16.msra.mxu0 %v3825_v58  ;;  %v1130_v57 = vld [vmem:[#allocation11 + $0x7a0] sm:$0xff]  ;;  %v3857_v58 = vcombine.low %v1132_v49, %v1134_v51  ;;  %v4744_v49 = vld [vmem:[#allocation11 + $0x5c8] sm:$0xff] }
 0x2e0   :  { %1799 = vmatprep.subr.bf16.mxu1 %v3758_v59  ;;  %1840 = vmatprep.subr.bf16.mxu0 %v3822_v60  ;;  %v3790_v59 = vcombine.high %v1064_v52, %v1066_v53  ;;  %v3854_v60 = vcombine.high %v1128_v56, %v1130_v57  ;;  %v1044_v31 = vld [vmem:[#allocation11 + $0x240] sm:$0xff]  ;;  %v4748_v51 = vld [vmem:[#allocation11 + $0x5e8] sm:$0xff] }
 0x2e1   :  { %v1046_v32 = vld [vmem:[#allocation11 + $0x260] sm:$0xff] }
 0x2e2   :  { %v1108_v33 = vld [vmem:[#allocation11 + $0x640] sm:$0xff]  ;;  %v3769_v35 = vcombine.low %v1044_v31, %v1046_v32 }
 0x2e3   :  { %1800 = vmatpush1.bf16.msra.mxu1 %v3757_v1  ;;  %1841 = vmatpush1.bf16.msra.mxu0 %v3821_v2  ;;  %v3789_v1 = vcombine.low %v1064_v52, %v1066_v53  ;;  %v3853_v2 = vcombine.low %v1128_v56, %v1130_v57  ;;  %v1040_v39 = vld [vmem:[#allocation11 + $0x200] sm:$0xff]  ;;  %v3763_v52 = vcombine.low %v4740_v47, %v4742_v48 }
 0x2e4   :  { %1801 = vmatprep.subr.bf16.mxu1 %v3754_v3  ;;  %1842 = vmatprep.subr.bf16.mxu0 %v3818_v4  ;;  %v3786_v3 = vcombine.high %v1060_v61, %v1062_v62  ;;  %v3850_v4 = vcombine.high %v1124_v63, %v1126_v0  ;;  %v1042_v40 = vld [vmem:[#allocation11 + $0x220] sm:$0xff]  ;;  %v3827_v53 = vcombine.low %v4744_v49, %v4748_v51 }
 0x2e5   :  { %v1104_v41 = vld [vmem:[#allocation11 + $0x600] sm:$0xff] }
 0x2e6   :  { %v1106_v43 = vld [vmem:[#allocation11 + $0x620] sm:$0xff] }
 0x2e7   :  { %1802 = vmatpush1.bf16.msra.mxu1 %v3753_v9  ;;  %1843 = vmatpush1.bf16.msra.mxu0 %v3817_v10  ;;  %v3785_v9 = vcombine.low %v1060_v61, %v1062_v62  ;;  %v3849_v10 = vcombine.low %v1124_v63, %v1126_v0  ;;  %v976_v63 = vlaneseq }
 0x2e8   :  { %1803 = vmatprep.subr.bf16.mxu1 %v3750_v11  ;;  %1844 = vmatprep.subr.bf16.mxu0 %v3814_v12  ;;  %v3782_v11 = vcombine.high %v1056_v5, %v1058_v6  ;;  %v3846_v12 = vcombine.high %v1120_v7, %v1122_v8 }
 0x2e9   :  { %v977_v0 = vshrl.u32 %v976_v63, 7 }
 0x2eb   :  { %1804 = vmatpush1.bf16.msra.mxu1 %v3749_v17  ;;  %1845 = vmatpush1.bf16.msra.mxu0 %v3813_v18  ;;  %v3781_v17 = vcombine.low %v1056_v5, %v1058_v6  ;;  %v3845_v18 = vcombine.low %v1120_v7, %v1122_v8  ;;  %v4762_v5 = vsub.s32 3, %v977_v0 }
 0x2ec   :  { %1805 = vmatprep.subr.bf16.mxu1 %v3746_v19  ;;  %1846 = vmatprep.subr.bf16.mxu0 %v3810_v20  ;;  %v3778_v19 = vcombine.high %v1052_v13, %v1054_v14  ;;  %v3842_v20 = vcombine.high %v1116_v15, %v1118_v16 }
 0x2ef   :  { %1806 = vmatpush1.bf16.msra.mxu1 %v3745_v25  ;;  %1847 = vmatpush1.bf16.msra.mxu0 %v3809_v26  ;;  %v3777_v25 = vcombine.low %v1052_v13, %v1054_v14  ;;  %v3841_v26 = vcombine.low %v1116_v15, %v1118_v16 }
 0x2f0   :  { %1807 = vmatprep.subr.bf16.mxu1 %v3742_v27  ;;  %1848 = vmatprep.subr.bf16.mxu0 %v3806_v28  ;;  %v3774_v27 = vcombine.high %v1048_v21, %v1050_v22  ;;  %v3838_v28 = vcombine.high %v1112_v23, %v1114_v24 }
 0x2f3   :  { %1808 = vmatpush1.bf16.msra.mxu1 %v3741_v29  ;;  %1849 = vmatpush1.bf16.msra.mxu0 %v3805_v30  ;;  %v3773_v29 = vcombine.low %v1048_v21, %v1050_v22  ;;  %v3837_v30 = vcombine.low %v1112_v23, %v1114_v24 }
 0x2f4   :  { %1809 = vmatprep.subr.bf16.mxu1 %v3738_v34  ;;  %1850 = vmatprep.subr.bf16.mxu0 %v3802_v38  ;;  %v1110_v34 = vld [vmem:[#allocation11 + $0x660] sm:$0xff] }
 0x2f5   :  { %v3834_v38 = vcombine.high %v1108_v33, %v1110_v34 }
 0x2f7   :  { %1810 = vmatpush1.bf16.msra.mxu1 %v3737_v36  ;;  %1851 = vmatpush1.bf16.msra.mxu0 %v3801_v37  ;;  %v3770_v36 = vcombine.high %v1044_v31, %v1046_v32  ;;  %v3833_v37 = vcombine.low %v1108_v33, %v1110_v34  ;;  %v1035_v31 = vld [vmem:[#allocation11 + $0x1a8] sm:$0xff] }
 0x2f8   :  { %1811 = vmatprep.subr.bf16.mxu1 %v3734_v42  ;;  %1852 = vmatprep.subr.bf16.mxu0 %v3798_v46  ;;  %v3766_v42 = vcombine.high %v1040_v39, %v1042_v40  ;;  %v3830_v46 = vcombine.high %v1104_v41, %v1106_v43  ;;  %v1097_v32 = vld [vmem:[#allocation11 + $0x588] sm:$0xff] }
 0x2f9   :  { %v1099_v33 = vld [vmem:[#allocation11 + $0x5a8] sm:$0xff] }
 0x2fb   :  { %1812 = vmatpush1.bf16.msra.mxu1 %v3733_v44  ;;  %1853 = vmatpush1.bf16.msra.mxu0 %v3797_v45  ;;  %v3765_v44 = vcombine.low %v1040_v39, %v1042_v40  ;;  %v3829_v45 = vcombine.low %v1104_v41, %v1106_v43  ;;  %v3824_v40 = vcombine.high %v1097_v32, %v1099_v33  ;;  %v1031_v41 = vld [vmem:[#allocation11 + $0x168] sm:$0xff] }
 0x2fc   :  { %1813 = vmatprep.subr.bf16.mxu1 %v3794_v50  ;;  %1854 = vmatprep.subr.bf16.mxu0 %v3858_v55  ;;  %v3764_v50 = vcombine.high %v4740_v47, %v4742_v48  ;;  %v1095_v43 = vld [vmem:[#allocation11 + $0x568] sm:$0xff] }
 0x2fd   :  { %v1025_v48 = vld [vmem:[#allocation11 + $0x108] sm:$0xff] }
 0x2ff   :  { %1814 = vmatpush2.bf16.msra.mxu1 %v3793_v54  ;;  %1855 = vmatpush2.bf16.msra.mxu0 %v3857_v58  ;;  %v3828_v54 = vcombine.high %v4744_v49, %v4748_v51  ;;  %v1027_v49 = vld [vmem:[#allocation11 + $0x128] sm:$0xff] }
 0x300   :  { %1815 = vmatprep.subr.bf16.mxu1 %v3790_v59  ;;  %1856 = vmatprep.subr.bf16.mxu0 %v3854_v60  ;;  %v1091_v51 = vld [vmem:[#allocation11 + $0x528] sm:$0xff] }
 0x303   :  { %1816 = vmatpush2.bf16.msra.mxu1 %v3789_v1  ;;  %1857 = vmatpush2.bf16.msra.mxu0 %v3853_v2  ;;  %v4756_v1 = vsub.s32 0, %v977_v0  ;;  %v4758_v2 = vsub.s32 2, %v977_v0 }
 0x304   :  { %1817 = vmatprep.subr.bf16.mxu1 %v3786_v3  ;;  %1858 = vmatprep.subr.bf16.mxu0 %v3850_v4  ;;  %v138_v3 = vld [vmem:[#allocation14 + $0x3] sm:$0xf]  ;;  %v4760_v4 = vsub.s32 1, %v977_v0  ;;  %v1017_v0 = vld [vmem:[#allocation11 + $0x88] sm:$0xff] }
 0x305   :  { %v979_v6 = vrot.slane %v138_v3, %v4756_v1  ;;  %v987_v7 = vrot.slane %v138_v3, %v4758_v2  ;;  %v991_v13 = vrot.slane %v138_v3, %v4762_v5 }
 0x307   :  { %1818 = vmatpush2.bf16.msra.mxu1 %v3785_v9  ;;  %1859 = vmatpush2.bf16.msra.mxu0 %v3849_v10 }
 0x308   :  { %1819 = vmatprep.subr.bf16.mxu1 %v3782_v11  ;;  %1860 = vmatprep.subr.bf16.mxu0 %v3846_v12  ;;  %v983_v12 = vrot.slane %v138_v3, %v4760_v4  ;;  %v1019_v3 = vld [vmem:[#allocation11 + $0xa8] sm:$0xff] }
 0x30b   :  { %1820 = vmatpush2.bf16.msra.mxu1 %v3781_v17  ;;  %1861 = vmatpush2.bf16.msra.mxu0 %v3845_v18 }
 0x30c   :  { %1821 = vmatprep.subr.bf16.mxu1 %v3778_v19  ;;  %1862 = vmatprep.subr.bf16.mxu0 %v3842_v20 }
 0x30f   :  { %1822 = vmatpush2.bf16.msra.mxu1 %v3777_v25  ;;  %1863 = vmatpush2.bf16.msra.mxu0 %v3841_v26 }
 0x310   :  { %1823 = vmatprep.subr.bf16.mxu1 %v3774_v27  ;;  %1864 = vmatprep.subr.bf16.mxu0 %v3838_v28 }
 0x313   :  { %1824 = vmatpush2.bf16.msra.mxu1 %v3773_v29  ;;  %1865 = vmatpush2.bf16.msra.mxu0 %v3837_v30  ;;  %v1033_v30 = vld [vmem:[#allocation11 + $0x188] sm:$0xff] }
 0x314   :  { %1825 = vmatprep.subr.bf16.mxu1 %v3770_v36  ;;  %1866 = vmatprep.subr.bf16.mxu0 %v3834_v38  ;;  %v1029_v38 = vld [vmem:[#allocation11 + $0x148] sm:$0xff]  ;;  %v3760_v39 = vcombine.high %v1033_v30, %v1035_v31 }
 0x317   :  { %1826 = vmatpush2.bf16.msra.mxu1 %v3769_v35  ;;  %1867 = vmatpush2.bf16.msra.mxu0 %v3833_v37 }
 0x318   :  { %1827 = vmatprep.subr.bf16.mxu1 %v3766_v42  ;;  %1868 = vmatprep.subr.bf16.mxu0 %v3830_v46  ;;  %v1093_v42 = vld [vmem:[#allocation11 + $0x548] sm:$0xff]  ;;  %v3756_v46 = vcombine.high %v1029_v38, %v1031_v41 }
 0x319   :  { %v3820_v47 = vcombine.high %v1093_v42, %v1095_v43 }
 0x31b   :  { %1828 = vmatpush2.bf16.msra.mxu1 %v3765_v44  ;;  %1869 = vmatpush2.bf16.msra.mxu0 %v3829_v45  ;;  %v3759_v44 = vcombine.low %v1033_v30, %v1035_v31  ;;  %v3823_v45 = vcombine.low %v1097_v32, %v1099_v33  ;;  %v1133_v30 = vld [vmem:[#allocation11 + $0x7c8] sm:$0xff] }
 0x31c   :  { %1879 = vmatprep.subr.bf16.mxu1 %v3764_v50  ;;  %1920 = vmatprep.subr.bf16.mxu0 %v3828_v54  ;;  %v1089_v50 = vld [vmem:[#allocation11 + $0x508] sm:$0xff]  ;;  %v3755_v54 = vcombine.low %v1029_v38, %v1031_v41 }
 0x31d   :  { %v1135_v31 = vld [vmem:[#allocation11 + $0x7e8] sm:$0xff] }
 0x31e   :  { %v1065_v38 = vld [vmem:[#allocation11 + $0x388] sm:$0xff] }
 0x31f   :  { %v1131_v41 = vld [vmem:[#allocation11 + $0x7a8] sm:$0xff] }
 0x37e   :  { %v685_v55 = vpop.f32.mrf.mxu1  ;;  %v726_v56 = vpop.f32.mrf.mxu0 }
 0x380   :  { %v687_v57 = vpop.f32.mrf.mxu1  ;;  %v728_v58 = vpop.f32.mrf.mxu0 }
 0x382   :  { %v689_v59 = vpop.f32.mrf.mxu1  ;;  %v730_v60 = vpop.f32.mrf.mxu0 }
 0x383   :  { %v1087_v59 = vld [vmem:[#allocation11 + $0x4e8] sm:$0xff]  ;;  %v3751_v60 = vcombine.low %v1025_v48, %v1027_v49 }
 0x384   :  { %v690_v61 = vpop.f32.mrf.mxu1  ;;  %v731_v62 = vpop.f32.mrf.mxu0 }
 0x385   :  { %v3815_v61 = vcombine.low %v1089_v50, %v1091_v51 }
 0x39e   :  { %v927_v8 = vpop.f32.mrf.mxu1  ;;  %v968_v9 = vpop.f32.mrf.mxu0 }
 0x39f   :  { %v928_v10 = vadd.f32 %v927_v8, %v685_v55  ;;  %v969_v11 = vadd.f32 %v968_v9, %v726_v56  ;;  %v3819_v55 = vcombine.low %v1093_v42, %v1095_v43  ;;  %v1021_v56 = vld [vmem:[#allocation11 + $0xc8] sm:$0xff]  ;;  %v3859_v43 = vcombine.low %v1133_v30, %v1135_v31 }
 0x3a0   :  { %v929_v14 = vpop.f32.mrf.mxu1  ;;  %v970_v15 = vpop.f32.mrf.mxu0 }
 0x3a1   :  { %v996_v16 = vadd.f32 %v979_v6, %v928_v10  ;;  %v998_v17 = vadd.f32 %v987_v7, %v969_v11  ;;  %v930_v18 = vadd.f32 %v929_v14, %v687_v57  ;;  %v971_v19 = vadd.f32 %v970_v15, %v728_v58  ;;  %v1023_v57 = vld [vmem:[#allocation11 + $0xe8] sm:$0xff] }
 0x3a2   :  { %v931_v20 = vpop.f32.mrf.mxu1  ;;  %v972_v21 = vpop.f32.mrf.mxu0  ;;  %v1085_v58 = vld [vmem:[#allocation11 + $0x4c8] sm:$0xff]  ;;  %v3748_v62 = vcombine.high %v1021_v56, %v1023_v57  ;;  %v3747_v8 = vcombine.low %v1021_v56, %v1023_v57  ;;  %v3744_v10 = vcombine.high %v1017_v0, %v1019_v3 }
 0x3a3   :  { %v997_v22 = vadd.f32 %v983_v12, %v930_v18  ;;  %v999_v23 = vadd.f32 %v991_v13, %v971_v19  ;;  %v1000_v24 = vmax.f32 %v996_v16, 0.0  ;;  %v1002_v25 = vmax.f32 %v998_v17, 0.0  ;;  %v1081_v6 = vld [vmem:[#allocation11 + $0x488] sm:$0xff] }
 0x3a4   :  { %v932_v26 = vpop.f32.mrf.mxu1  ;;  %v973_v27 = vpop.f32.mrf.mxu0  ;;  %v3812_v63 = vcombine.high %v1085_v58, %v1087_v59  ;;  %v1083_v7 = vld [vmem:[#allocation11 + $0x4a8] sm:$0xff]  ;;  %v3811_v9 = vcombine.low %v1085_v58, %v1087_v59  ;;  %v3743_v16 = vcombine.low %v1017_v0, %v1019_v3 }
 0x3a5   :  { %v1001_v28 = vmax.f32 %v997_v22, 0.0  ;;  %v1003_v29 = vmax.f32 %v999_v23, 0.0  ;;  %v4768_v36 = vpack.c.bf16 %v1000_v24, %v1000_v24  ;;  %v4770_v37 = vpack.c.bf16 %v1002_v25, %v1002_v25  ;;  %v1013_v12 = vld [vmem:[#allocation11 + $0x48] sm:$0xff] }
 0x3a6   :  { %v3808_v11 = vcombine.high %v1081_v6, %v1083_v7  ;;  %v1015_v13 = vld [vmem:[#allocation11 + $0x68] sm:$0xff]  ;;  %v3807_v17 = vcombine.low %v1081_v6, %v1083_v7 }
 0x3a7   :  { %v1005_v34 = vpack.c.bf16 %v1001_v28, %v1001_v28  ;;  %v1007_v35 = vpack.c.bf16 %v1003_v29, %v1003_v29  ;;  %v1077_v14 = vld [vmem:[#allocation11 + $0x448] sm:$0xff]  ;;  %v3740_v18 = vcombine.high %v1013_v12, %v1015_v13  ;;  %v3739_v24 = vcombine.low %v1013_v12, %v1015_v13 }
 0x3a8   :  { %v1079_v15 = vld [vmem:[#allocation11 + $0x468] sm:$0xff] }
 0x3a9   :  { %1829 = vmatprep.mubr.bf16.mxu1 %v1005_v34  ;;  %1870 = vmatprep.mubr.bf16.mxu0 %v1007_v35  ;;  %v3804_v19 = vcombine.high %v1077_v14, %v1079_v15  ;;  %v1009_v20 = vld [vmem:[#allocation11 + $0x8] sm:$0xff]  ;;  %v3803_v25 = vcombine.low %v1077_v14, %v1079_v15 }
 0x3aa   :  { %1830 = vmatmul.mubr.bf16.vlgmr.msra.gmra.mxu1 %v4768_v36  ;;  %1871 = vmatmul.mubr.bf16.vlgmr.msra.gmra.mxu0 %v4770_v37  ;;  %v1011_v21 = vld [vmem:[#allocation11 + $0x28] sm:$0xff] }
 0x3ab   :  { %1880 = vmatpush1.bf16.msra.mxu1 %v3763_v52  ;;  %1921 = vmatpush1.bf16.msra.mxu0 %v3827_v53  ;;  %v3752_v52 = vcombine.high %v1025_v48, %v1027_v49  ;;  %v3816_v53 = vcombine.high %v1089_v50, %v1091_v51  ;;  %v1073_v22 = vld [vmem:[#allocation11 + $0x408] sm:$0xff]  ;;  %v3736_v26 = vcombine.high %v1009_v20, %v1011_v21 }
 0x3ac   :  { %1911 = vmatprep.mubr.bf16.mxu1 %v1005_v34  ;;  %1952 = vmatprep.mubr.bf16.mxu0 %v1007_v35  ;;  %v1075_v23 = vld [vmem:[#allocation11 + $0x428] sm:$0xff]  ;;  %v3735_v32 = vcombine.low %v1009_v20, %v1011_v21  ;;  %v3860_v35 = vcombine.high %v1133_v30, %v1135_v31 }
 0x3ad   :  { %1881 = vmatprep.subr.bf16.mxu1 %v3760_v39  ;;  %1922 = vmatprep.subr.bf16.mxu0 %v3824_v40  ;;  %v3800_v27 = vcombine.high %v1073_v22, %v1075_v23  ;;  %v1069_v28 = vld [vmem:[#allocation11 + $0x3c8] sm:$0xff]  ;;  %v3799_v33 = vcombine.low %v1073_v22, %v1075_v23 }
 0x3ae   :  { %v1071_v29 = vld [vmem:[#allocation11 + $0x3e8] sm:$0xff] }
 0x3af   :  { %1882 = vmatpush1.bf16.msra.mxu1 %v3759_v44  ;;  %1923 = vmatpush1.bf16.msra.mxu0 %v3823_v45  ;;  %v3796_v34 = vcombine.high %v1069_v28, %v1071_v29  ;;  %v1067_v39 = vld [vmem:[#allocation11 + $0x3a8] sm:$0xff]  ;;  %v3795_v42 = vcombine.low %v1069_v28, %v1071_v29 }
 0x3b0   :  { %1883 = vmatprep.subr.bf16.mxu1 %v3756_v46  ;;  %1924 = vmatprep.subr.bf16.mxu0 %v3820_v47  ;;  %v1129_v40 = vld [vmem:[#allocation11 + $0x788] sm:$0xff]  ;;  %v3792_v44 = vcombine.high %v1065_v38, %v1067_v39  ;;  %v3791_v50 = vcombine.low %v1065_v38, %v1067_v39 }
 0x3b1   :  { %v3856_v45 = vcombine.high %v1129_v40, %v1131_v41  ;;  %v1061_v46 = vld [vmem:[#allocation11 + $0x348] sm:$0xff]  ;;  %v3855_v51 = vcombine.low %v1129_v40, %v1131_v41  ;;  %v1993_v41 = vld [vmem:[#allocation11 + $0x190] sm:$0xff] }
 0x3b2   :  { %v1063_v47 = vld [vmem:[#allocation11 + $0x368] sm:$0xff] }
 0x3b3   :  { %1884 = vmatpush1.bf16.msra.mxu1 %v3755_v54  ;;  %1925 = vmatpush1.bf16.msra.mxu0 %v3819_v55  ;;  %v1125_v48 = vld [vmem:[#allocation11 + $0x748] sm:$0xff]  ;;  %v3788_v54 = vcombine.high %v1061_v46, %v1063_v47  ;;  %v3787_v58 = vcombine.low %v1061_v46, %v1063_v47  ;;  %v1991_v46 = vld [vmem:[#allocation11 + $0x170] sm:$0xff] }
 0x3b4   :  { %1885 = vmatprep.subr.bf16.mxu1 %v3752_v52  ;;  %1926 = vmatprep.subr.bf16.mxu0 %v3816_v53  ;;  %v1127_v49 = vld [vmem:[#allocation11 + $0x768] sm:$0xff] }
 0x3b5   :  { %v3852_v55 = vcombine.high %v1125_v48, %v1127_v49  ;;  %v1057_v52 = vld [vmem:[#allocation11 + $0x308] sm:$0xff]  ;;  %v3851_v59 = vcombine.low %v1125_v48, %v1127_v49  ;;  %v1985_v49 = vld [vmem:[#allocation11 + $0x110] sm:$0xff] }
 0x3b6   :  { %v1059_v53 = vld [vmem:[#allocation11 + $0x328] sm:$0xff] }
 0x3b7   :  { %1886 = vmatpush1.bf16.msra.mxu1 %v3751_v60  ;;  %1927 = vmatpush1.bf16.msra.mxu0 %v3815_v61  ;;  %v1121_v56 = vld [vmem:[#allocation11 + $0x708] sm:$0xff]  ;;  %v3784_v60 = vcombine.high %v1057_v52, %v1059_v53  ;;  %v3783_v6 = vcombine.low %v1057_v52, %v1059_v53  ;;  %v1983_v52 = vld [vmem:[#allocation11 + $0xf0] sm:$0xff] }
 0x3b8   :  { %1887 = vmatprep.subr.bf16.mxu1 %v3748_v62  ;;  %1928 = vmatprep.subr.bf16.mxu0 %v3812_v63  ;;  %v1123_v57 = vld [vmem:[#allocation11 + $0x728] sm:$0xff]  ;;  %v2061_v53 = vld [vmem:[#allocation11 + $0x5d0] sm:$0xff] }
 0x3b9   :  { %v3848_v61 = vcombine.high %v1121_v56, %v1123_v57  ;;  %v1053_v62 = vld [vmem:[#allocation11 + $0x2c8] sm:$0xff]  ;;  %v3847_v7 = vcombine.low %v1121_v56, %v1123_v57  ;;  %v2063_v56 = vld [vmem:[#allocation11 + $0x5f0] sm:$0xff] }
 0x3ba   :  { %v1055_v63 = vld [vmem:[#allocation11 + $0x2e8] sm:$0xff] }
 0x3bb   :  { %1888 = vmatpush1.bf16.msra.mxu1 %v3747_v8  ;;  %1929 = vmatpush1.bf16.msra.mxu0 %v3811_v9  ;;  %v1117_v0 = vld [vmem:[#allocation11 + $0x6c8] sm:$0xff]  ;;  %v3780_v8 = vcombine.high %v1053_v62, %v1055_v63  ;;  %v3779_v14 = vcombine.low %v1053_v62, %v1055_v63  ;;  %v1979_v62 = vld [vmem:[#allocation11 + $0xb0] sm:$0xff] }
 0x3bc   :  { %1889 = vmatprep.subr.bf16.mxu1 %v3744_v10  ;;  %1930 = vmatprep.subr.bf16.mxu0 %v3808_v11  ;;  %v1119_v3 = vld [vmem:[#allocation11 + $0x6e8] sm:$0xff] }
 0x3bd   :  { %v3844_v9 = vcombine.high %v1117_v0, %v1119_v3  ;;  %v1049_v10 = vld [vmem:[#allocation11 + $0x288] sm:$0xff]  ;;  %v3843_v15 = vcombine.low %v1117_v0, %v1119_v3  ;;  %v2057_v0 = vld [vmem:[#allocation11 + $0x590] sm:$0xff] }
 0x3be   :  { %v1051_v11 = vld [vmem:[#allocation11 + $0x2a8] sm:$0xff]  ;;  %v2059_v3 = vld [vmem:[#allocation11 + $0x5b0] sm:$0xff] }
 0x3bf   :  { %1890 = vmatpush1.bf16.msra.mxu1 %v3743_v16  ;;  %1931 = vmatpush1.bf16.msra.mxu0 %v3807_v17  ;;  %v1113_v12 = vld [vmem:[#allocation11 + $0x688] sm:$0xff]  ;;  %v3776_v16 = vcombine.high %v1049_v10, %v1051_v11  ;;  %v3775_v22 = vcombine.low %v1049_v10, %v1051_v11  ;;  %v1973_v10 = vld [vmem:[#allocation11 + $0x50] sm:$0xff] }
 0x3c0   :  { %1891 = vmatprep.subr.bf16.mxu1 %v3740_v18  ;;  %1932 = vmatprep.subr.bf16.mxu0 %v3804_v19  ;;  %v1115_v13 = vld [vmem:[#allocation11 + $0x6a8] sm:$0xff]  ;;  %v1975_v11 = vld [vmem:[#allocation11 + $0x70] sm:$0xff] }
 0x3c1   :  { %v3840_v17 = vcombine.high %v1113_v12, %v1115_v13  ;;  %v1045_v18 = vld [vmem:[#allocation11 + $0x248] sm:$0xff]  ;;  %v3839_v23 = vcombine.low %v1113_v12, %v1115_v13  ;;  %v2053_v12 = vld [vmem:[#allocation11 + $0x550] sm:$0xff] }
 0x3c2   :  { %v1047_v19 = vld [vmem:[#allocation11 + $0x268] sm:$0xff]  ;;  %v2055_v13 = vld [vmem:[#allocation11 + $0x570] sm:$0xff] }
 0x3c3   :  { %1892 = vmatpush1.bf16.msra.mxu1 %v3739_v24  ;;  %1933 = vmatpush1.bf16.msra.mxu0 %v3803_v25  ;;  %v1109_v20 = vld [vmem:[#allocation11 + $0x648] sm:$0xff]  ;;  %v3772_v24 = vcombine.high %v1045_v18, %v1047_v19  ;;  %v3771_v30 = vcombine.low %v1045_v18, %v1047_v19  ;;  %v1969_v18 = vld [vmem:[#allocation11 + $0x10] sm:$0xff] }
 0x3c4   :  { %1893 = vmatprep.subr.bf16.mxu1 %v3736_v26  ;;  %1934 = vmatprep.subr.bf16.mxu0 %v3800_v27  ;;  %v1111_v21 = vld [vmem:[#allocation11 + $0x668] sm:$0xff]  ;;  %v1971_v19 = vld [vmem:[#allocation11 + $0x30] sm:$0xff] }
 0x3c5   :  { %v3836_v25 = vcombine.high %v1109_v20, %v1111_v21  ;;  %v1041_v26 = vld [vmem:[#allocation11 + $0x208] sm:$0xff]  ;;  %v3835_v31 = vcombine.low %v1109_v20, %v1111_v21  ;;  %v2049_v20 = vld [vmem:[#allocation11 + $0x510] sm:$0xff] }
 0x3c6   :  { %v1043_v27 = vld [vmem:[#allocation11 + $0x228] sm:$0xff]  ;;  %v2051_v21 = vld [vmem:[#allocation11 + $0x530] sm:$0xff] }
 0x3c7   :  { %1894 = vmatpush1.bf16.msra.mxu1 %v3735_v32  ;;  %1935 = vmatpush1.bf16.msra.mxu0 %v3799_v33  ;;  %v1105_v28 = vld [vmem:[#allocation11 + $0x608] sm:$0xff]  ;;  %v3768_v32 = vcombine.high %v1041_v26, %v1043_v27  ;;  %v3767_v38 = vcombine.low %v1041_v26, %v1043_v27  ;;  %v2029_v26 = vld [vmem:[#allocation11 + $0x3d0] sm:$0xff] }
 0x3c8   :  { %1895 = vmatprep.subr.bf16.mxu1 %v3796_v34  ;;  %1936 = vmatprep.subr.bf16.mxu0 %v3860_v35  ;;  %v1107_v29 = vld [vmem:[#allocation11 + $0x628] sm:$0xff]  ;;  %v1997_v34 = vld [vmem:[#allocation11 + $0x1d0] sm:$0xff] }
 0x3c9   :  { %v3832_v33 = vcombine.high %v1105_v28, %v1107_v29  ;;  %v1999_v35 = vld [vmem:[#allocation11 + $0x1f0] sm:$0xff]  ;;  %v3831_v39 = vcombine.low %v1105_v28, %v1107_v29 }
 0x3ca   :  { %v3890_v40 = vcombine.high %v1997_v34, %v1999_v35  ;;  %v2031_v27 = vld [vmem:[#allocation11 + $0x3f0] sm:$0xff] }
 0x3cb   :  { %1896 = vmatpush2.bf16.msra.mxu1 %v3795_v42  ;;  %1937 = vmatpush2.bf16.msra.mxu0 %v3859_v43  ;;  %v1995_v42 = vld [vmem:[#allocation11 + $0x1b0] sm:$0xff]  ;;  %v3889_v43 = vcombine.low %v1997_v34, %v1999_v35 }
 0x3cc   :  { %1897 = vmatprep.subr.bf16.mxu1 %v3792_v44  ;;  %1938 = vmatprep.subr.bf16.mxu0 %v3856_v45  ;;  %v3886_v44 = vcombine.high %v1993_v41, %v1995_v42  ;;  %v1989_v45 = vld [vmem:[#allocation11 + $0x150] sm:$0xff]  ;;  %v3885_v47 = vcombine.low %v1993_v41, %v1995_v42 }
 0x3cd   :  { %v3882_v48 = vcombine.high %v1989_v45, %v1991_v46  ;;  %v2045_v28 = vld [vmem:[#allocation11 + $0x4d0] sm:$0xff] }
 0x3ce   :  { %v2047_v29 = vld [vmem:[#allocation11 + $0x4f0] sm:$0xff] }
 0x3cf   :  { %1898 = vmatpush2.bf16.msra.mxu1 %v3791_v50  ;;  %1939 = vmatpush2.bf16.msra.mxu0 %v3855_v51  ;;  %v1987_v50 = vld [vmem:[#allocation11 + $0x130] sm:$0xff]  ;;  %v3881_v51 = vcombine.low %v1989_v45, %v1991_v46 }
 0x3d0   :  { %1899 = vmatprep.subr.bf16.mxu1 %v3788_v54  ;;  %1940 = vmatprep.subr.bf16.mxu0 %v3852_v55  ;;  %v3878_v54 = vcombine.high %v1985_v49, %v1987_v50  ;;  %v1981_v55 = vld [vmem:[#allocation11 + $0xd0] sm:$0xff]  ;;  %v3877_v57 = vcombine.low %v1985_v49, %v1987_v50 }
 0x3d1   :  { %v2025_v34 = vld [vmem:[#allocation11 + $0x390] sm:$0xff] }
 0x3d2   :  { %v2027_v35 = vld [vmem:[#allocation11 + $0x3b0] sm:$0xff] }
 0x3d3   :  { %1900 = vmatpush2.bf16.msra.mxu1 %v3787_v58  ;;  %1941 = vmatpush2.bf16.msra.mxu0 %v3851_v59  ;;  %v3953_v58 = vcombine.low %v2061_v53, %v2063_v56  ;;  %v4776_v59 = vld [vmem:[#allocation11 + $0x1d8] sm:$0xff]  ;;  %v2023_v45 = vld [vmem:[#allocation11 + $0x370] sm:$0xff] }
 0x3d4   :  { %1901 = vmatprep.subr.bf16.mxu1 %v3784_v60  ;;  %1942 = vmatprep.subr.bf16.mxu0 %v3848_v61  ;;  %v3874_v60 = vcombine.high %v1981_v55, %v1983_v52  ;;  %v1977_v61 = vld [vmem:[#allocation11 + $0x90] sm:$0xff] }
 0x3d5   :  { %v2037_v46 = vld [vmem:[#allocation11 + $0x450] sm:$0xff] }
 0x3d7   :  { %1902 = vmatpush2.bf16.msra.mxu1 %v3783_v6  ;;  %1943 = vmatpush2.bf16.msra.mxu0 %v3847_v7  ;;  %v3873_v6 = vcombine.low %v1981_v55, %v1983_v52  ;;  %v3949_v7 = vcombine.low %v2057_v0, %v2059_v3  ;;  %v2019_v55 = vld [vmem:[#allocation11 + $0x330] sm:$0xff] }
 0x3d8   :  { %1903 = vmatprep.subr.bf16.mxu1 %v3780_v8  ;;  %1944 = vmatprep.subr.bf16.mxu0 %v3844_v9  ;;  %v3950_v8 = vcombine.high %v2057_v0, %v2059_v3  ;;  %v3870_v9 = vcombine.high %v1977_v61, %v1979_v62  ;;  %v2033_v52 = vld [vmem:[#allocation11 + $0x410] sm:$0xff] }
 0x3d9   :  { %v2095_v0 = vld [vmem:[#allocation11 + $0x7f0] sm:$0xff] }
 0x3db   :  { %1904 = vmatpush2.bf16.msra.mxu1 %v3779_v14  ;;  %1945 = vmatpush2.bf16.msra.mxu0 %v3843_v15  ;;  %v3869_v14 = vcombine.low %v1977_v61, %v1979_v62  ;;  %v3945_v15 = vcombine.low %v2053_v12, %v2055_v13  ;;  %v2015_v61 = vld [vmem:[#allocation11 + $0x2f0] sm:$0xff] }
 0x3dc   :  { %1905 = vmatprep.subr.bf16.mxu1 %v3776_v16  ;;  %1946 = vmatprep.subr.bf16.mxu0 %v3840_v17  ;;  %v3946_v16 = vcombine.high %v2053_v12, %v2055_v13  ;;  %v3866_v17 = vcombine.high %v1973_v10, %v1975_v11  ;;  %v2093_v62 = vld [vmem:[#allocation11 + $0x7d0] sm:$0xff] }
 0x3dd   :  { %v2091_v12 = vld [vmem:[#allocation11 + $0x7b0] sm:$0xff] }
 0x3df   :  { %1906 = vmatpush2.bf16.msra.mxu1 %v3775_v22  ;;  %1947 = vmatpush2.bf16.msra.mxu0 %v3839_v23  ;;  %v3865_v22 = vcombine.low %v1973_v10, %v1975_v11  ;;  %v3941_v23 = vcombine.low %v2049_v20, %v2051_v21  ;;  %v2011_v10 = vld [vmem:[#allocation11 + $0x2b0] sm:$0xff] }
 0x3e0   :  { %1907 = vmatprep.subr.bf16.mxu1 %v3772_v24  ;;  %1948 = vmatprep.subr.bf16.mxu0 %v3836_v25  ;;  %v3942_v24 = vcombine.high %v2049_v20, %v2051_v21  ;;  %v3862_v25 = vcombine.high %v1969_v18, %v1971_v19  ;;  %v2089_v11 = vld [vmem:[#allocation11 + $0x790] sm:$0xff] }
 0x3e1   :  { %v2087_v20 = vld [vmem:[#allocation11 + $0x770] sm:$0xff] }
 0x3e3   :  { %1908 = vmatpush2.bf16.msra.mxu1 %v3771_v30  ;;  %1949 = vmatpush2.bf16.msra.mxu0 %v3835_v31  ;;  %v3861_v30 = vcombine.low %v1969_v18, %v1971_v19  ;;  %v3937_v31 = vcombine.low %v2045_v28, %v2047_v29  ;;  %v2007_v18 = vld [vmem:[#allocation11 + $0x270] sm:$0xff] }
 0x3e4   :  { %1909 = vmatprep.subr.bf16.mxu1 %v3768_v32  ;;  %1950 = vmatprep.subr.bf16.mxu0 %v3832_v33  ;;  %v3938_v32 = vcombine.high %v2045_v28, %v2047_v29  ;;  %v3922_v33 = vcombine.high %v2029_v26, %v2031_v27  ;;  %v2085_v19 = vld [vmem:[#allocation11 + $0x750] sm:$0xff] }
 0x3e5   :  { %v2083_v28 = vld [vmem:[#allocation11 + $0x730] sm:$0xff] }
 0x3e7   :  { %1910 = vmatpush2.bf16.msra.mxu1 %v3767_v38  ;;  %1951 = vmatpush2.bf16.msra.mxu0 %v3831_v39  ;;  %v2041_v38 = vld [vmem:[#allocation11 + $0x490] sm:$0xff] }
 0x3e8   :  { %2758 = vmatprep.subr.bf16.mxu1 %v3890_v40  ;;  %v2043_v39 = vld [vmem:[#allocation11 + $0x4b0] sm:$0xff]  ;;  %v3921_v40 = vcombine.low %v2029_v26, %v2031_v27 }
 0x3e9   :  { %v3933_v41 = vcombine.low %v2041_v38, %v2043_v39  ;;  %v3934_v42 = vcombine.high %v2041_v38, %v2043_v39  ;;  %v2003_v26 = vld [vmem:[#allocation11 + $0x230] sm:$0xff] }
 0x3ea   :  { %1912 = vmatmul.mubr.bf16.vlgmr.msra.gmra.mxu1 %v4768_v36  ;;  %1953 = vmatmul.mubr.bf16.vlgmr.msra.gmra.mxu0 %v4770_v37  ;;  %v3954_v36 = vcombine.high %v2061_v53, %v2063_v56  ;;  %v4778_v37 = vld [vmem:[#allocation11 + $0x1f8] sm:$0xff]  ;;  %v2035_v53 = vld [vmem:[#allocation11 + $0x430] sm:$0xff] }
 0x3eb   :  { %2759 = vmatpush1.bf16.msra.mxu1 %v3889_v43  ;;  %v3891_v63 = vcombine.low %v4776_v59, %v4778_v37  ;;  %v3918_v43 = vcombine.high %v2025_v34, %v2027_v35  ;;  %v2081_v27 = vld [vmem:[#allocation11 + $0x710] sm:$0xff] }
 0x3ec   :  { %2760 = vmatprep.subr.bf16.mxu1 %v3886_v44  ;;  %2799 = vmatprep.subr.bf16.mxu0 %v3954_v36  ;;  %v2021_v44 = vld [vmem:[#allocation11 + $0x350] sm:$0xff] }
 0x3ed   :  { %2800 = vmatpush1.bf16.msra.mxu0 %v3953_v58  ;;  %v3913_v56 = vcombine.low %v2021_v44, %v2023_v45  ;;  %v3926_v58 = vcombine.high %v2033_v52, %v2035_v53 }
 0x3ee   :  { %2801 = vmatprep.subr.bf16.mxu0 %v3950_v8 }
 0x3ef   :  { %2761 = vmatpush1.bf16.msra.mxu1 %v3885_v47  ;;  %v2039_v47 = vld [vmem:[#allocation11 + $0x470] sm:$0xff] }
 0x3f0   :  { %2762 = vmatprep.subr.bf16.mxu1 %v3882_v48  ;;  %v3917_v48 = vcombine.low %v2025_v34, %v2027_v35  ;;  %v3929_v49 = vcombine.low %v2037_v46, %v2039_v47  ;;  %v3930_v50 = vcombine.high %v2037_v46, %v2039_v47  ;;  %v2079_v34 = vld [vmem:[#allocation11 + $0x6f0] sm:$0xff] }
 0x3f1   :  { %2802 = vmatpush1.bf16.msra.mxu0 %v3949_v7  ;;  %v3986_v7 = vcombine.high %v2093_v62, %v2095_v0  ;;  %v2071_v46 = vld [vmem:[#allocation11 + $0x670] sm:$0xff] }
 0x3f2   :  { %2803 = vmatprep.subr.bf16.mxu0 %v3946_v16 }
 0x3f3   :  { %2763 = vmatpush1.bf16.msra.mxu1 %v3881_v51  ;;  %v3914_v51 = vcombine.high %v2021_v44, %v2023_v45  ;;  %v2069_v45 = vld [vmem:[#allocation11 + $0x650] sm:$0xff] }
 0x3f4   :  { %2764 = vmatprep.subr.bf16.mxu1 %v3878_v54  ;;  %v2017_v54 = vld [vmem:[#allocation11 + $0x310] sm:$0xff]  ;;  %v3962_v47 = vcombine.high %v2069_v45, %v2071_v46 }
 0x3f5   :  { %2804 = vmatpush1.bf16.msra.mxu0 %v3945_v15  ;;  %v3910_v36 = vcombine.high %v2017_v54, %v2019_v55  ;;  %v3909_v3 = vcombine.low %v2017_v54, %v2019_v55  ;;  %v3982_v15 = vcombine.high %v2089_v11, %v2091_v12  ;;  %v4784_v55 = vld [vmem:[#allocation11 + $0x5d8] sm:$0xff] }
 0x3f6   :  { %2805 = vmatprep.subr.bf16.mxu0 %v3942_v24 }
 0x3f7   :  { %2765 = vmatpush1.bf16.msra.mxu1 %v3877_v57  ;;  %v3925_v57 = vcombine.low %v2033_v52, %v2035_v53  ;;  %v4786_v52 = vld [vmem:[#allocation11 + $0x5f8] sm:$0xff] }
 0x3f8   :  { %2766 = vmatprep.subr.bf16.mxu1 %v3874_v60  ;;  %v2013_v60 = vld [vmem:[#allocation11 + $0x2d0] sm:$0xff]  ;;  %v3956_v53 = vcombine.high %v4784_v55, %v4786_v52 }
 0x3f9   :  { %2806 = vmatpush1.bf16.msra.mxu0 %v3941_v23  ;;  %v3906_v8 = vcombine.high %v2013_v60, %v2015_v61  ;;  %v3905_v13 = vcombine.low %v2013_v60, %v2015_v61  ;;  %v3978_v23 = vcombine.high %v2085_v19, %v2087_v20 }
 0x3fa   :  { %2807 = vmatprep.subr.bf16.mxu0 %v3938_v32 }
 0x3fb   :  { %2767 = vmatpush1.bf16.msra.mxu1 %v3873_v6  ;;  %v3985_v6 = vcombine.low %v2093_v62, %v2095_v0 }
 0x3fc   :  { %2768 = vmatprep.subr.bf16.mxu1 %v3870_v9  ;;  %v2009_v9 = vld [vmem:[#allocation11 + $0x290] sm:$0xff] }
 0x3fd   :  { %2808 = vmatpush1.bf16.msra.mxu0 %v3937_v31  ;;  %v3902_v16 = vcombine.high %v2009_v9, %v2011_v10  ;;  %v3901_v21 = vcombine.low %v2009_v9, %v2011_v10  ;;  %v3974_v31 = vcombine.high %v2081_v27, %v2083_v28 }
 0x3fe   :  { %2809 = vmatprep.subr.bf16.mxu0 %v3934_v42  ;;  %v2075_v42 = vld [vmem:[#allocation11 + $0x6b0] sm:$0xff] }
 0x3ff   :  { %2769 = vmatpush1.bf16.msra.mxu1 %v3869_v14  ;;  %v3981_v14 = vcombine.low %v2089_v11, %v2091_v12 }
 0x400   :  { %2770 = vmatprep.subr.bf16.mxu1 %v3866_v17  ;;  %v2005_v17 = vld [vmem:[#allocation11 + $0x250] sm:$0xff] }
 0x401   :  { %2810 = vmatpush1.bf16.msra.mxu0 %v3933_v41  ;;  %v3898_v24 = vcombine.high %v2005_v17, %v2007_v18  ;;  %v3897_v29 = vcombine.low %v2005_v17, %v2007_v18  ;;  %v2073_v41 = vld [vmem:[#allocation11 + $0x690] sm:$0xff] }
 0x402   :  { %2811 = vmatprep.subr.bf16.mxu0 %v3930_v50  ;;  %v3966_v44 = vcombine.high %v2073_v41, %v2075_v42  ;;  %v2067_v50 = vld [vmem:[#allocation11 + $0x630] sm:$0xff] }
 0x403   :  { %2771 = vmatpush1.bf16.msra.mxu1 %v3865_v22  ;;  %v3977_v22 = vcombine.low %v2085_v19, %v2087_v20  ;;  %v1990_v20 = vld [vmem:[#allocation11 + $0x158] sm:$0xff] }
 0x404   :  { %2772 = vmatprep.subr.bf16.mxu1 %v3862_v25  ;;  %v2001_v25 = vld [vmem:[#allocation11 + $0x210] sm:$0xff] }
 0x405   :  { %2812 = vmatpush1.bf16.msra.mxu0 %v3929_v49  ;;  %v3894_v32 = vcombine.high %v2001_v25, %v2003_v26  ;;  %v3893_v35 = vcombine.low %v2001_v25, %v2003_v26  ;;  %v2065_v49 = vld [vmem:[#allocation11 + $0x610] sm:$0xff]  ;;  %v1988_v25 = vld [vmem:[#allocation11 + $0x138] sm:$0xff] }
 0x406   :  { %2813 = vmatprep.subr.bf16.mxu0 %v3926_v58  ;;  %v3957_v54 = vcombine.low %v2065_v49, %v2067_v50 }
 0x407   :  { %2773 = vmatpush1.bf16.msra.mxu1 %v3861_v30  ;;  %v3973_v30 = vcombine.low %v2081_v27, %v2083_v28  ;;  %v1982_v28 = vld [vmem:[#allocation11 + $0xd8] sm:$0xff] }
 0x408   :  { %2774 = vmatprep.subr.bf16.mxu1 %v3922_v33  ;;  %v2077_v33 = vld [vmem:[#allocation11 + $0x6d0] sm:$0xff] }
 0x409   :  { %2814 = vmatpush1.bf16.msra.mxu0 %v3925_v57  ;;  %v3969_v38 = vcombine.low %v2077_v33, %v2079_v34  ;;  %v3970_v39 = vcombine.high %v2077_v33, %v2079_v34  ;;  %v4792_v57 = vld [vmem:[#allocation14 + $0x7] sm:$0xf]  ;;  %v1980_v33 = vld [vmem:[#allocation11 + $0xb8] sm:$0xff] }
 0x40a   :  { %2815 = vmatprep.subr.bf16.mxu0 %v3986_v7  ;;  %v1140_v58 = vrot.slane %v4792_v57, %v4756_v1  ;;  %v1976_v34 = vld [vmem:[#allocation11 + $0x78] sm:$0xff] }
 0x40b   :  { %2775 = vmatpush2.bf16.msra.mxu1 %v3921_v40  ;;  %v3892_v40 = vcombine.high %v4776_v59, %v4778_v37 }
 0x40c   :  { %2776 = vmatprep.subr.bf16.mxu1 %v3918_v43  ;;  %v3965_v43 = vcombine.low %v2073_v41, %v2075_v42 }
 0x40d   :  { %2816 = vmatpush2.bf16.msra.mxu0 %v3985_v6 }
 0x40e   :  { %2817 = vmatprep.subr.bf16.mxu0 %v3982_v15  ;;  %v1994_v15 = vld [vmem:[#allocation11 + $0x198] sm:$0xff] }
 0x40f   :  { %2777 = vmatpush2.bf16.msra.mxu1 %v3917_v48  ;;  %v3961_v48 = vcombine.low %v2069_v45, %v2071_v46 }
 0x410   :  { %2778 = vmatprep.subr.bf16.mxu1 %v3914_v51  ;;  %v3958_v51 = vcombine.high %v2065_v49, %v2067_v50 }
 0x411   :  { %2818 = vmatpush2.bf16.msra.mxu0 %v3981_v14 }
 0x412   :  { %2819 = vmatprep.subr.bf16.mxu0 %v3978_v23 }
 0x413   :  { %2779 = vmatpush2.bf16.msra.mxu1 %v3913_v56  ;;  %v3955_v56 = vcombine.low %v4784_v55, %v4786_v52  ;;  %v4343_v55 = vld [vmem:[#allocation13 + $0x60] ss:$8 sps:$4 sm:$0xff]  }
 0x414   :  { %2780 = vmatprep.subr.bf16.mxu1 %v3910_v36  ;;  %v1144_v36 = vrot.slane %v4792_v57, %v4760_v4 }
 0x415   :  { %2820 = vmatpush2.bf16.msra.mxu0 %v3977_v22 }
 0x416   :  { %2821 = vmatprep.subr.bf16.mxu0 %v3974_v31 }
 0x417   :  { %2781 = vmatpush2.bf16.msra.mxu1 %v3909_v3 }
 0x418   :  { %2782 = vmatprep.subr.bf16.mxu1 %v3906_v8 }
 0x419   :  { %2822 = vmatpush2.bf16.msra.mxu0 %v3973_v30 }
 0x41a   :  { %2823 = vmatprep.subr.bf16.mxu0 %v3970_v39  ;;  %v1970_v39 = vld [vmem:[#allocation11 + $0x18] sm:$0xff] }
 0x41b   :  { %2783 = vmatpush2.bf16.msra.mxu1 %v3905_v13 }
 0x41c   :  { %2784 = vmatprep.subr.bf16.mxu1 %v3902_v16  ;;  %v1996_v16 = vld [vmem:[#allocation11 + $0x1b8] sm:$0xff] }
 0x41d   :  { %2824 = vmatpush2.bf16.msra.mxu0 %v3969_v38  ;;  %v3888_v19 = vcombine.high %v1994_v15, %v1996_v16  ;;  %v3887_v22 = vcombine.low %v1994_v15, %v1996_v16 }
 0x41e   :  { %2825 = vmatprep.subr.bf16.mxu0 %v3966_v44  ;;  %v2032_v44 = vld [vmem:[#allocation11 + $0x3f8] sm:$0xff] }
 0x41f   :  { %2785 = vmatpush2.bf16.msra.mxu1 %v3901_v21  ;;  %v1992_v21 = vld [vmem:[#allocation11 + $0x178] sm:$0xff] }
 0x420   :  { %2786 = vmatprep.subr.bf16.mxu1 %v3898_v24  ;;  %v3884_v23 = vcombine.high %v1990_v20, %v1992_v21  ;;  %v1986_v24 = vld [vmem:[#allocation11 + $0x118] sm:$0xff]  ;;  %v3883_v26 = vcombine.low %v1990_v20, %v1992_v21 }
 0x421   :  { %2826 = vmatpush2.bf16.msra.mxu0 %v3965_v43  ;;  %v3880_v27 = vcombine.high %v1986_v24, %v1988_v25  ;;  %v3879_v30 = vcombine.low %v1986_v24, %v1988_v25  ;;  %v2030_v43 = vld [vmem:[#allocation11 + $0x3d8] sm:$0xff] }
 0x422   :  { %2827 = vmatprep.subr.bf16.mxu0 %v3962_v47  ;;  %v3924_v46 = vcombine.high %v2030_v43, %v2032_v44  ;;  %v2026_v47 = vld [vmem:[#allocation11 + $0x398] sm:$0xff]  ;;  %v3923_v49 = vcombine.low %v2030_v43, %v2032_v44 }
 0x423   :  { %2787 = vmatpush2.bf16.msra.mxu1 %v3897_v29  ;;  %v1984_v29 = vld [vmem:[#allocation11 + $0xf8] sm:$0xff] }
 0x424   :  { %2788 = vmatprep.subr.bf16.mxu1 %v3894_v32  ;;  %v3876_v31 = vcombine.high %v1982_v28, %v1984_v29  ;;  %v1978_v32 = vld [vmem:[#allocation11 + $0x98] sm:$0xff]  ;;  %v3875_v59 = vcombine.low %v1982_v28, %v1984_v29 }
 0x425   :  { %2828 = vmatpush2.bf16.msra.mxu0 %v3961_v48  ;;  %v3872_v37 = vcombine.high %v1978_v32, %v1980_v33  ;;  %v2028_v48 = vld [vmem:[#allocation11 + $0x3b8] sm:$0xff] }
 0x426   :  { %2829 = vmatprep.subr.bf16.mxu0 %v3958_v51  ;;  %v3920_v50 = vcombine.high %v2026_v47, %v2028_v48  ;;  %v2022_v51 = vld [vmem:[#allocation11 + $0x358] sm:$0xff] }
 0x427   :  { %2789 = vmatpush2.bf16.msra.mxu1 %v3893_v35  ;;  %v3871_v35 = vcombine.low %v1978_v32, %v1980_v33  ;;  %v2004_v20 = vld [vmem:[#allocation11 + $0x238] sm:$0xff] }
 0x428   :  { %2840 = vmatprep.subr.bf16.mxu1 %v3892_v40  ;;  %v1972_v40 = vld [vmem:[#allocation11 + $0x38] sm:$0xff] }
 0x429   :  { %2830 = vmatpush2.bf16.msra.mxu0 %v3957_v54  ;;  %v3864_v42 = vcombine.high %v1970_v39, %v1972_v40  ;;  %v3863_v45 = vcombine.low %v1970_v39, %v1972_v40  ;;  %v2024_v54 = vld [vmem:[#allocation11 + $0x378] sm:$0xff] }
 0x42a   :  { %2881 = vmatprep.subr.bf16.mxu0 %v3956_v53  ;;  %v3919_v53 = vcombine.low %v2026_v47, %v2028_v48 }
 0x46a   :  { %v1831_v60 = vpop.f32.mrf.mxu1  ;;  %v1872_v61 = vpop.f32.mrf.mxu0 }
 0x46b   :  { %v1832_v62 = vadd.f32 %v1831_v60, %v1140_v58  ;;  %v3916_v58 = vcombine.high %v2022_v51, %v2024_v54  ;;  %v2020_v60 = vld [vmem:[#allocation11 + $0x338] sm:$0xff] }
 0x46c   :  { %v1833_v0 = vpop.f32.mrf.mxu1  ;;  %v1874_v3 = vpop.f32.mrf.mxu0 }
 0x46d   :  { %v1873_v6 = vadd.f32 %v1872_v61, %v1832_v62  ;;  %v1834_v7 = vadd.f32 %v1833_v0, %v1144_v36  ;;  %v2018_v36 = vld [vmem:[#allocation11 + $0x318] sm:$0xff]  ;;  %v3915_v61 = vcombine.low %v2022_v51, %v2024_v54  ;;  %v4342_v51 = vld [vmem:[#allocation13 + $0xe0] ss:$8 sps:$4 sm:$0xff]  }
 0x46e   :  { %v1835_v8 = vpop.f32.mrf.mxu1  ;;  %v1876_v9 = vpop.f32.mrf.mxu0  ;;  %v3912_v62 = vcombine.high %v2018_v36, %v2020_v60  ;;  %v2014_v0 = vld [vmem:[#allocation11 + $0x2d8] sm:$0xff] }
 0x46f   :  { %v1875_v10 = vadd.f32 %v1874_v3, %v1834_v7  ;;  %v1961_v11 = vmax.f32 %v1873_v6, 0.0  ;;  %v2016_v3 = vld [vmem:[#allocation11 + $0x2f8] sm:$0xff]  ;;  %v3911_v6 = vcombine.low %v2018_v36, %v2020_v60 }
 0x470   :  { %v1836_v12 = vpop.f32.mrf.mxu1  ;;  %v1877_v13 = vpop.f32.mrf.mxu0  ;;  %v3908_v7 = vcombine.high %v2014_v0, %v2016_v3  ;;  %v2010_v8 = vld [vmem:[#allocation11 + $0x298] sm:$0xff] }
 0x471   :  { %v1962_v14 = vmax.f32 %v1875_v10, 0.0  ;;  %v4798_v18 = vpack.c.bf16 %v1961_v11, %v1961_v11  ;;  %v2012_v9 = vld [vmem:[#allocation11 + $0x2b8] sm:$0xff]  ;;  %v3907_v10 = vcombine.low %v2014_v0, %v2016_v3  ;;  %v4346_v0 = vld [vmem:[#allocation13 + $0xc0] ss:$8 sps:$4 sm:$0xff]  }
 0x472   :  { %v3904_v11 = vcombine.high %v2010_v8, %v2012_v9  ;;  %v2006_v12 = vld [vmem:[#allocation11 + $0x258] sm:$0xff]  ;;  %v3903_v15 = vcombine.low %v2010_v8, %v2012_v9  ;;  %v4347_v8 = vld [vmem:[#allocation13 + $0x40] ss:$8 sps:$4 sm:$0xff]  }
 0x473   :  { %v1966_v17 = vpack.c.bf16 %v1962_v14, %v1962_v14  ;;  %v2008_v13 = vld [vmem:[#allocation11 + $0x278] sm:$0xff]  ;;  %v1148_v14 = vrot.slane %v4792_v57, %v4758_v2 }
 0x474   :  { %v3900_v16 = vcombine.high %v2006_v12, %v2008_v13  ;;  %v3899_v24 = vcombine.low %v2006_v12, %v2008_v13  ;;  %v2046_v54 = vld [vmem:[#allocation11 + $0x4d8] sm:$0xff] }
 0x475   :  { %2790 = vmatprep.mubr.bf16.mxu1 %v1966_v17  ;;  %v2044_v36 = vld [vmem:[#allocation11 + $0x4b8] sm:$0xff] }
 0x476   :  { %2791 = vmatmul.mubr.bf16.vlgmr.msra.gmra.mxu1 %v4798_v18  ;;  %v2038_v3 = vld [vmem:[#allocation11 + $0x458] sm:$0xff] }
 0x477   :  { %2841 = vmatpush1.bf16.msra.mxu1 %v3891_v63  ;;  %2872 = vmatprep.mubr.bf16.mxu1 %v1966_v17  ;;  %v1974_v63 = vld [vmem:[#allocation11 + $0x58] sm:$0xff]  ;;  %v1152_v17 = vrot.slane %v4792_v57, %v4762_v5 }
 0x478   :  { %2842 = vmatprep.subr.bf16.mxu1 %v3888_v19  ;;  %v3868_v38 = vcombine.high %v1974_v63, %v1976_v34  ;;  %v3867_v41 = vcombine.low %v1974_v63, %v1976_v34  ;;  %v2002_v19 = vld [vmem:[#allocation11 + $0x218] sm:$0xff] }
 0x479   :  { %v3895_v33 = vcombine.low %v2002_v19, %v2004_v20  ;;  %v2058_v34 = vld [vmem:[#allocation11 + $0x598] sm:$0xff] }
 0x47a   :  { %v2036_v12 = vld [vmem:[#allocation11 + $0x438] sm:$0xff] }
 0x47b   :  { %2843 = vmatpush1.bf16.msra.mxu1 %v3887_v22 }
 0x47c   :  { %2844 = vmatprep.subr.bf16.mxu1 %v3884_v23 }
 0x47f   :  { %2845 = vmatpush1.bf16.msra.mxu1 %v3883_v26 }
 0x480   :  { %2846 = vmatprep.subr.bf16.mxu1 %v3880_v27  ;;  %v3896_v27 = vcombine.high %v2002_v19, %v2004_v20  ;;  %v2096_v19 = vld [vmem:[#allocation11 + $0x7f8] sm:$0xff] }
 0x483   :  { %2847 = vmatpush1.bf16.msra.mxu1 %v3879_v30 }
 0x484   :  { %2848 = vmatprep.subr.bf16.mxu1 %v3876_v31 }
 0x487   :  { %2849 = vmatpush1.bf16.msra.mxu1 %v3875_v59 }
 0x488   :  { %2850 = vmatprep.subr.bf16.mxu1 %v3872_v37 }
 0x48b   :  { %2851 = vmatpush1.bf16.msra.mxu1 %v3871_v35  ;;  %v2060_v35 = vld [vmem:[#allocation11 + $0x5b8] sm:$0xff] }
 0x48c   :  { %2852 = vmatprep.subr.bf16.mxu1 %v3868_v38  ;;  %v3952_v40 = vcombine.high %v2058_v34, %v2060_v35  ;;  %v3951_v43 = vcombine.low %v2058_v34, %v2060_v35  ;;  %v2074_v35 = vld [vmem:[#allocation11 + $0x698] sm:$0xff] }
 0x48f   :  { %2853 = vmatpush1.bf16.msra.mxu1 %v3867_v41  ;;  %v2054_v41 = vld [vmem:[#allocation11 + $0x558] sm:$0xff] }
 0x490   :  { %2854 = vmatprep.subr.bf16.mxu1 %v3864_v42  ;;  %v2056_v42 = vld [vmem:[#allocation11 + $0x578] sm:$0xff] }
 0x491   :  { %v3948_v44 = vcombine.high %v2054_v41, %v2056_v42  ;;  %v3947_v47 = vcombine.low %v2054_v41, %v2056_v42  ;;  %v2070_v42 = vld [vmem:[#allocation11 + $0x658] sm:$0xff] }
 0x493   :  { %2855 = vmatpush1.bf16.msra.mxu1 %v3863_v45  ;;  %v2050_v45 = vld [vmem:[#allocation11 + $0x518] sm:$0xff] }
 0x494   :  { %2856 = vmatprep.subr.bf16.mxu1 %v3924_v46  ;;  %v2052_v46 = vld [vmem:[#allocation11 + $0x538] sm:$0xff] }
 0x495   :  { %v3944_v48 = vcombine.high %v2050_v45, %v2052_v46 }
 0x497   :  { %2857 = vmatpush2.bf16.msra.mxu1 %v3923_v49  ;;  %v4340_v49 = vld [vmem:[#allocation13 + $0xf0] ss:$8 sps:$4 sm:$0xff]  }
 0x498   :  { %2858 = vmatprep.subr.bf16.mxu1 %v3920_v50  ;;  %v4341_v50 = vld [vmem:[#allocation13 + $0x70] ss:$8 sps:$4 sm:$0xff]  }
 0x49b   :  { %2859 = vmatpush2.bf16.msra.mxu1 %v3919_v53  ;;  %v2048_v53 = vld [vmem:[#allocation11 + $0x4f8] sm:$0xff] }
 0x49c   :  { %2860 = vmatprep.subr.bf16.mxu1 %v3916_v58  ;;  %v3940_v52 = vcombine.high %v2046_v54, %v2048_v53  ;;  %v2042_v58 = vld [vmem:[#allocation11 + $0x498] sm:$0xff]  ;;  %v3939_v60 = vcombine.low %v2046_v54, %v2048_v53  ;;  %v4354_v53 = vld [vmem:[#allocation13 + $0x80] ss:$8 sps:$4 sm:$0xff]  }
 0x49d   :  { %v4353_v54 = vld [vmem:[#allocation13 + $0x10] ss:$8 sps:$4 sm:$0xff]  }
 0x49f   :  { %2861 = vmatpush2.bf16.msra.mxu1 %v3915_v61  ;;  %v4345_v61 = vld [vmem:[#allocation13 + $0x50] ss:$8 sps:$4 sm:$0xff]  }
 0x4a0   :  { %2862 = vmatprep.subr.bf16.mxu1 %v3912_v62  ;;  %v3936_v62 = vcombine.high %v2042_v58, %v2044_v36 }
 0x4a3   :  { %2863 = vmatpush2.bf16.msra.mxu1 %v3911_v6  ;;  %v2040_v6 = vld [vmem:[#allocation11 + $0x478] sm:$0xff] }
 0x4a4   :  { %2864 = vmatprep.subr.bf16.mxu1 %v3908_v7  ;;  %v3935_v7 = vcombine.low %v2042_v58, %v2044_v36  ;;  %v3932_v9 = vcombine.high %v2038_v3, %v2040_v6  ;;  %v3931_v13 = vcombine.low %v2038_v3, %v2040_v6  ;;  %v4374_v58 = vld [vmem:[#allocation13 + $0x1e0] ss:$8 sps:$4 sm:$0xff]   ;;  %v4381_v3 = vld [vmem:[#allocation13 + $0x130] ss:$8 sps:$4 sm:$0xff]  }
 0x4a5   :  { %v4375_v36 = vld [vmem:[#allocation13 + $0x160] ss:$8 sps:$4 sm:$0xff]  }
 0x4a6   :  { %v4382_v6 = vld [vmem:[#allocation13 + $0x1a0] ss:$8 sps:$4 sm:$0xff]  }
 0x4a7   :  { %2865 = vmatpush2.bf16.msra.mxu1 %v3907_v10  ;;  %v4348_v10 = vld [vmem:[#allocation13 + $0xb0] ss:$8 sps:$4 sm:$0xff]  }
 0x4a8   :  { %2866 = vmatprep.subr.bf16.mxu1 %v3904_v11  ;;  %v2034_v11 = vld [vmem:[#allocation11 + $0x418] sm:$0xff] }
 0x4a9   :  { %v3927_v20 = vcombine.low %v2034_v11, %v2036_v12 }
 0x4aa   :  { %v1913_v21 = vpop.f32.mrf.mxu1  ;;  %v1954_v22 = vpop.f32.mrf.mxu0 }
 0x4ab   :  { %v1914_v23 = vadd.f32 %v1913_v21, %v1148_v14  ;;  %2867 = vmatpush2.bf16.msra.mxu1 %v3903_v15  ;;  %v4349_v14 = vld [vmem:[#allocation13 + $0x30] ss:$8 sps:$4 sm:$0xff]   ;;  %v3928_v15 = vcombine.high %v2034_v11, %v2036_v12  ;;  %v4351_v21 = vld [vmem:[#allocation13 + $0x20] ss:$8 sps:$4 sm:$0xff]  }
 0x4ac   :  { %v1915_v25 = vpop.f32.mrf.mxu1  ;;  %v1956_v26 = vpop.f32.mrf.mxu0  ;;  %2868 = vmatprep.subr.bf16.mxu1 %v3900_v16  ;;  %v4350_v16 = vld [vmem:[#allocation13 + $0xa0] ss:$8 sps:$4 sm:$0xff]  }
 0x4ad   :  { %v1955_v28 = vadd.f32 %v1954_v22, %v1914_v23  ;;  %v1916_v29 = vadd.f32 %v1915_v25, %v1152_v17  ;;  %v2094_v17 = vld [vmem:[#allocation11 + $0x7d8] sm:$0xff]  ;;  %v4386_v12 = vld [vmem:[#allocation13 + $0x180] ss:$8 sps:$4 sm:$0xff]  }
 0x4ae   :  { %v1917_v30 = vpop.f32.mrf.mxu1  ;;  %v1958_v31 = vpop.f32.mrf.mxu0  ;;  %v3988_v22 = vcombine.high %v2094_v17, %v2096_v19  ;;  %v2090_v23 = vld [vmem:[#allocation11 + $0x798] sm:$0xff]  ;;  %v3987_v25 = vcombine.low %v2094_v17, %v2096_v19  ;;  %v140_v17 = vld [vmem:[#allocation14 + $0xb] sm:$0xf] }
 0x4af   :  { %v1957_v32 = vadd.f32 %v1956_v26, %v1916_v29  ;;  %2869 = vmatpush2.bf16.msra.mxu1 %v3899_v24  ;;  %v1963_v59 = vmax.f32 %v1955_v28, 0.0  ;;  %v2092_v24 = vld [vmem:[#allocation11 + $0x7b8] sm:$0xff]  ;;  %v2101_v19 = vrot.slane %v140_v17, %v4756_v1  ;;  %v4358_v1 = vld [vmem:[#allocation13 + $0xe4] ss:$8 sps:$4 sm:$0xff]  }
 0x4b0   :  { %v1918_v57 = vpop.f32.mrf.mxu1  ;;  %v1959_v37 = vpop.f32.mrf.mxu0  ;;  %2870 = vmatprep.subr.bf16.mxu1 %v3896_v27  ;;  %v3984_v26 = vcombine.high %v2090_v23, %v2092_v24  ;;  %v2086_v27 = vld [vmem:[#allocation11 + $0x758] sm:$0xff]  ;;  %v3983_v29 = vcombine.low %v2090_v23, %v2092_v24 }
 0x4b1   :  { %v1964_v63 = vmax.f32 %v1957_v32, 0.0  ;;  %v4808_v39 = vpack.c.bf16 %v1963_v59, %v1963_v59  ;;  %v2088_v28 = vld [vmem:[#allocation11 + $0x778] sm:$0xff] }
 0x4b2   :  { %v3980_v30 = vcombine.high %v2086_v27, %v2088_v28  ;;  %v2082_v31 = vld [vmem:[#allocation11 + $0x718] sm:$0xff] }
 0x4b3   :  { %v1968_v38 = vpack.c.bf16 %v1964_v63, %v1964_v63  ;;  %2871 = vmatpush2.bf16.msra.mxu1 %v3895_v33  ;;  %v2084_v32 = vld [vmem:[#allocation11 + $0x738] sm:$0xff]  ;;  %v3979_v33 = vcombine.low %v2086_v27, %v2088_v28 }
 0x4b4   :  { %4075 = vmatprep.subr.bf16.mxu1 %v4340_v49  ;;  %v3976_v59 = vcombine.high %v2082_v31, %v2084_v32  ;;  %v2078_v57 = vld [vmem:[#allocation11 + $0x6d8] sm:$0xff]  ;;  %v3975_v63 = vcombine.low %v2082_v31, %v2084_v32 }
 0x4b5   :  { %2831 = vmatprep.mubr.bf16.mxu0 %v1968_v38  ;;  %v2080_v37 = vld [vmem:[#allocation11 + $0x6f8] sm:$0xff] }
 0x4b6   :  { %2832 = vmatmul.mubr.bf16.vlgmr.msra.gmra.mxu0 %v4808_v39  ;;  %2873 = vmatmul.mubr.bf16.vlgmr.msra.gmra.mxu1 %v4798_v18  ;;  %v3943_v18 = vcombine.low %v2050_v45, %v2052_v46  ;;  %v3972_v34 = vcombine.high %v2078_v57, %v2080_v37  ;;  %v2066_v46 = vld [vmem:[#allocation11 + $0x618] sm:$0xff] }
 0x4b7   :  { %2882 = vmatpush1.bf16.msra.mxu0 %v3955_v56  ;;  %2913 = vmatprep.mubr.bf16.mxu0 %v1968_v38  ;;  %v4344_v56 = vld [vmem:[#allocation13 + $0xd0] ss:$8 sps:$4 sm:$0xff]  }
 0x4b8   :  { %2883 = vmatprep.subr.bf16.mxu0 %v3952_v40  ;;  %4076 = vmatpush3.bf16.msra.mxu1 %v4341_v50  ;;  %v2076_v38 = vld [vmem:[#allocation11 + $0x6b8] sm:$0xff]  ;;  %v3971_v40 = vcombine.low %v2078_v57, %v2080_v37 }
 0x4b9   :  { %4077 = vmatprep.subr.bf16.mxu1 %v4342_v51  ;;  %v3968_v41 = vcombine.high %v2074_v35, %v2076_v38  ;;  %v4352_v51 = vld [vmem:[#allocation13 + $0x90] ss:$8 sps:$4 sm:$0xff]   ;;  %v4357_v37 = vld [vmem:[#allocation13 + $0x74] ss:$8 sps:$4 sm:$0xff]  }
 0x4bb   :  { %2884 = vmatpush1.bf16.msra.mxu0 %v3951_v43  ;;  %v2072_v43 = vld [vmem:[#allocation11 + $0x678] sm:$0xff] }
 0x4bc   :  { %2885 = vmatprep.subr.bf16.mxu0 %v3948_v44  ;;  %4078 = vmatpush3.bf16.msra.mxu1 %v4343_v55  ;;  %v3967_v44 = vcombine.low %v2074_v35, %v2076_v38  ;;  %v3964_v45 = vcombine.high %v2070_v42, %v2072_v43  ;;  %v4356_v55 = vld [vmem:[#allocation13 + $0xf4] ss:$8 sps:$4 sm:$0xff]   ;;  %v4362_v38 = vld [vmem:[#allocation13 + $0xc4] ss:$8 sps:$4 sm:$0xff]  }
 0x4bd   :  { %4079 = vmatprep.subr.bf16.mxu1 %v4344_v56  ;;  %v4373_v56 = vld [vmem:[#allocation13 + $0x170] ss:$8 sps:$4 sm:$0xff]   ;;  %v4361_v35 = vld [vmem:[#allocation13 + $0x54] ss:$8 sps:$4 sm:$0xff]  }
 0x4bf   :  { %2886 = vmatpush1.bf16.msra.mxu0 %v3947_v47  ;;  %v2068_v47 = vld [vmem:[#allocation11 + $0x638] sm:$0xff] }
 0x4c0   :  { %2887 = vmatprep.subr.bf16.mxu0 %v3944_v48  ;;  %4080 = vmatpush3.bf16.msra.mxu1 %v4345_v61  ;;  %v3963_v48 = vcombine.low %v2070_v42, %v2072_v43  ;;  %v3960_v49 = vcombine.high %v2066_v46, %v2068_v47  ;;  %v3959_v50 = vcombine.low %v2066_v46, %v2068_v47  ;;  %v4378_v61 = vld [vmem:[#allocation13 + $0x1c0] ss:$8 sps:$4 sm:$0xff]   ;;  %v4365_v42 = vld [vmem:[#allocation13 + $0x34] ss:$8 sps:$4 sm:$0xff]   ;;  %v4366_v43 = vld [vmem:[#allocation13 + $0xa4] ss:$8 sps:$4 sm:$0xff]  }
 0x4c1   :  { %4081 = vmatprep.subr.bf16.mxu1 %v4346_v0  ;;  %v4380_v0 = vld [vmem:[#allocation13 + $0x1b0] ss:$8 sps:$4 sm:$0xff]   ;;  %v4369_v46 = vld [vmem:[#allocation13 + $0x14] ss:$8 sps:$4 sm:$0xff]   ;;  %v4370_v47 = vld [vmem:[#allocation13 + $0x84] ss:$8 sps:$4 sm:$0xff]  }
 0x4c3   :  { %2888 = vmatpush1.bf16.msra.mxu0 %v3943_v18  ;;  %v4355_v18 = vld [vmem:[#allocation13] ss:$8 sps:$4 sm:$0xff]  }
 0x4c4   :  { %2889 = vmatprep.subr.bf16.mxu0 %v3940_v52  ;;  %4082 = vmatpush3.bf16.msra.mxu1 %v4347_v8  ;;  %v4372_v52 = vld [vmem:[#allocation13 + $0x1f0] ss:$8 sps:$4 sm:$0xff]  }
 0x4c5   :  { %4083 = vmatprep.subr.bf16.mxu1 %v4348_v10  ;;  %v4384_v8 = vld [vmem:[#allocation13 + $0x190] ss:$8 sps:$4 sm:$0xff]  }
 0x4c6   :  { %v4385_v10 = vld [vmem:[#allocation13 + $0x110] ss:$8 sps:$4 sm:$0xff]  }
 0x4c7   :  { %2890 = vmatpush1.bf16.msra.mxu0 %v3939_v60  ;;  %v4376_v60 = vld [vmem:[#allocation13 + $0x1d0] ss:$8 sps:$4 sm:$0xff]  }
 0x4c8   :  { %2891 = vmatprep.subr.bf16.mxu0 %v3936_v62  ;;  %4084 = vmatpush3.bf16.msra.mxu1 %v4349_v14  ;;  %v4379_v62 = vld [vmem:[#allocation13 + $0x140] ss:$8 sps:$4 sm:$0xff]  }
 0x4c9   :  { %4085 = vmatprep.subr.bf16.mxu1 %v4350_v16  ;;  %v4387_v14 = vld [vmem:[#allocation13 + $0x100] ss:$8 sps:$4 sm:$0xff]   ;;  %v4388_v16 = vld [vmem:[#allocation13 + $0x1f4] ss:$8 sps:$4 sm:$0xff]  }
 0x4cb   :  { %2892 = vmatpush1.bf16.msra.mxu0 %v3935_v7  ;;  %v4383_v7 = vld [vmem:[#allocation13 + $0x120] ss:$8 sps:$4 sm:$0xff]  }
 0x4cc   :  { %2893 = vmatprep.subr.bf16.mxu0 %v3932_v9  ;;  %4086 = vmatpush3.bf16.msra.mxu1 %v4351_v21 }
 0x4cd   :  { %4087 = vmatprep.subr.bf16.mxu1 %v4352_v51 }
 0x4cf   :  { %2894 = vmatpush1.bf16.msra.mxu0 %v3931_v13 }
 0x4d0   :  { %2895 = vmatprep.subr.bf16.mxu0 %v3928_v15  ;;  %4088 = vmatpush3.bf16.msra.mxu1 %v4353_v54 }
 0x4d1   :  { %4089 = vmatprep.subr.bf16.mxu1 %v4354_v53 }
 0x4d3   :  { %2896 = vmatpush1.bf16.msra.mxu0 %v3927_v20  ;;  %v2105_v20 = vrot.slane %v140_v17, %v4760_v4  ;;  %v4359_v4 = vld [vmem:[#allocation13 + $0x64] ss:$8 sps:$4 sm:$0xff]  }
 0x4d4   :  { %2897 = vmatprep.subr.bf16.mxu0 %v3988_v22  ;;  %4090 = vmatpush3.bf16.msra.mxu1 %v4355_v18 }
 0x4d5   :  { %4119 = vmatprep.subr.bf16.mxu1 %v4356_v55 }
 0x4d7   :  { %2898 = vmatpush2.bf16.msra.mxu0 %v3987_v25 }
 0x4d8   :  { %2899 = vmatprep.subr.bf16.mxu0 %v3984_v26 }
 0x4db   :  { %2900 = vmatpush2.bf16.msra.mxu0 %v3983_v29 }
 0x4dc   :  { %2901 = vmatprep.subr.bf16.mxu0 %v3980_v30 }
 0x4df   :  { %2902 = vmatpush2.bf16.msra.mxu0 %v3979_v33 }
 0x4e0   :  { %2903 = vmatprep.subr.bf16.mxu0 %v3976_v59 }
 0x4e3   :  { %2904 = vmatpush2.bf16.msra.mxu0 %v3975_v63 }
 0x4e4   :  { %2905 = vmatprep.subr.bf16.mxu0 %v3972_v34  ;;  %v4360_v34 = vld [vmem:[#allocation13 + $0xd4] ss:$8 sps:$4 sm:$0xff]  }
 0x4e7   :  { %2906 = vmatpush2.bf16.msra.mxu0 %v3971_v40  ;;  %v4363_v40 = vld [vmem:[#allocation13 + $0x44] ss:$8 sps:$4 sm:$0xff]  }
 0x4e8   :  { %2907 = vmatprep.subr.bf16.mxu0 %v3968_v41  ;;  %v4364_v41 = vld [vmem:[#allocation13 + $0xb4] ss:$8 sps:$4 sm:$0xff]  }
 0x4eb   :  { %2908 = vmatpush2.bf16.msra.mxu0 %v3967_v44  ;;  %v4367_v44 = vld [vmem:[#allocation13 + $0x24] ss:$8 sps:$4 sm:$0xff]  }
 0x4ec   :  { %2909 = vmatprep.subr.bf16.mxu0 %v3964_v45  ;;  %v4368_v45 = vld [vmem:[#allocation13 + $0x94] ss:$8 sps:$4 sm:$0xff]  }
 0x4ef   :  { %2910 = vmatpush2.bf16.msra.mxu0 %v3963_v48  ;;  %v4371_v48 = vld [vmem:[#allocation13 + $0x4] ss:$8 sps:$4 sm:$0xff]  }
 0x4f0   :  { %2911 = vmatprep.subr.bf16.mxu0 %v3960_v49  ;;  %v2109_v49 = vrot.slane %v140_v17, %v4758_v2  ;;  %v4391_v2 = vld [vmem:[#allocation13 + $0x164] ss:$8 sps:$4 sm:$0xff]  }
 0x4f3   :  { %2912 = vmatpush2.bf16.msra.mxu0 %v3959_v50  ;;  %v2113_v50 = vrot.slane %v140_v17, %v4762_v5  ;;  %v4392_v5 = vld [vmem:[#allocation13 + $0x1d4] ss:$8 sps:$4 sm:$0xff]  }
 0x4f4   :  { %4097 = vmatprep.subr.bf16.mxu0 %v4372_v52 }
 0x4f6   :  { %2914 = vmatmul.mubr.bf16.vlgmr.msra.gmra.mxu0 %v4808_v39  ;;  %v4377_v39 = vld [vmem:[#allocation13 + $0x150] ss:$8 sps:$4 sm:$0xff]  }
 0x4f7   :  { %4098 = vmatpush3.bf16.msra.mxu0 %v4373_v56 }
 0x4f8   :  { %4099 = vmatprep.subr.bf16.mxu0 %v4374_v58 }
 0x4fb   :  { %4100 = vmatpush3.bf16.msra.mxu0 %v4375_v36 }
 0x4fc   :  { %4101 = vmatprep.subr.bf16.mxu0 %v4376_v60 }
 0x4ff   :  { %4102 = vmatpush3.bf16.msra.mxu0 %v4377_v39 }
 0x500   :  { %4103 = vmatprep.subr.bf16.mxu0 %v4378_v61  ;;  %v4389_v61 = vld [vmem:[#allocation13 + $0x174] ss:$8 sps:$4 sm:$0xff]  }
 0x503   :  { %4104 = vmatpush3.bf16.msra.mxu0 %v4379_v62 }
 0x504   :  { %4105 = vmatprep.subr.bf16.mxu0 %v4380_v0  ;;  %v4390_v0 = vld [vmem:[#allocation13 + $0x1e4] ss:$8 sps:$4 sm:$0xff]  }
 0x507   :  { %4106 = vmatpush3.bf16.msra.mxu0 %v4381_v3  ;;  %v4393_v3 = vld [vmem:[#allocation13 + $0x154] ss:$8 sps:$4 sm:$0xff]  }
 0x508   :  { %4107 = vmatprep.subr.bf16.mxu0 %v4382_v6  ;;  %v4394_v6 = vld [vmem:[#allocation13 + $0x1c4] ss:$8 sps:$4 sm:$0xff]  }
 0x50b   :  { %4108 = vmatpush3.bf16.msra.mxu0 %v4383_v7  ;;  %v4395_v7 = vld [vmem:[#allocation13 + $0x144] ss:$8 sps:$4 sm:$0xff]  }
 0x50c   :  { %4109 = vmatprep.subr.bf16.mxu0 %v4384_v8  ;;  %v4396_v8 = vld [vmem:[#allocation13 + $0x1b4] ss:$8 sps:$4 sm:$0xff]  }
 0x50f   :  { %4110 = vmatpush3.bf16.msra.mxu0 %v4385_v10  ;;  %v4398_v10 = vld [vmem:[#allocation13 + $0x1a4] ss:$8 sps:$4 sm:$0xff]  }
 0x510   :  { %4111 = vmatprep.subr.bf16.mxu0 %v4386_v12  ;;  %v4400_v12 = vld [vmem:[#allocation13 + $0x194] ss:$8 sps:$4 sm:$0xff]  }
 0x513   :  { %4112 = vmatpush3.bf16.msra.mxu0 %v4387_v14  ;;  %v4402_v14 = vld [vmem:[#allocation13 + $0x184] ss:$8 sps:$4 sm:$0xff]  }
 0x514   :  { %4141 = vmatprep.subr.bf16.mxu0 %v4388_v16 }
 0x536   :  { %v2792_v9 = vpop.f32.mrf.mxu1 }
 0x537   :  { %v2793_v21 = vadd.f32 %v2792_v9, %v2101_v19  ;;  %v4397_v9 = vld [vmem:[#allocation13 + $0x134] ss:$8 sps:$4 sm:$0xff]  }
 0x538   :  { %v2794_v11 = vpop.f32.mrf.mxu1 }
 0x539   :  { %v2795_v24 = vadd.f32 %v2794_v11, %v2105_v20  ;;  %v4399_v11 = vld [vmem:[#allocation13 + $0x124] ss:$8 sps:$4 sm:$0xff]  }
 0x53a   :  { %v2796_v13 = vpop.f32.mrf.mxu1 }
 0x53b   :  { %v4401_v13 = vld [vmem:[#allocation13 + $0x114] ss:$8 sps:$4 sm:$0xff]  }
 0x53c   :  { %v2797_v15 = vpop.f32.mrf.mxu1 }
 0x53d   :  { %v4403_v15 = vld [vmem:[#allocation13 + $0x104] ss:$8 sps:$4 sm:$0xff]  }
 0x576   :  { %v2833_v22 = vpop.f32.mrf.mxu0  ;;  %v2874_v23 = vpop.f32.mrf.mxu1 }
 0x577   :  { %v2834_v25 = vadd.f32 %v2833_v22, %v2793_v21  ;;  %v2875_v51 = vadd.f32 %v2874_v23, %v2109_v49 }
 0x578   :  { %v2835_v26 = vpop.f32.mrf.mxu0  ;;  %v2876_v27 = vpop.f32.mrf.mxu1 }
 0x579   :  { %v2836_v28 = vadd.f32 %v2835_v26, %v2795_v24  ;;  %v2922_v29 = vmax.f32 %v2834_v25, 0.0  ;;  %v2877_v53 = vadd.f32 %v2876_v27, %v2113_v50  ;;  %v3989_v26 = vld [vmem:[#allocation14 + $0xf] ss:$0 sm:$0xff] }
 0x57a   :  { %v2837_v30 = vpop.f32.mrf.mxu0  ;;  %v2878_v31 = vpop.f32.mrf.mxu1 }
 0x57b   :  { %v2923_v32 = vmax.f32 %v2836_v28, 0.0  ;;  %v2926_v63 = vpack.c.bf16 %v2922_v29, %v2922_v29 }
 0x57c   :  { %v2838_v33 = vpop.f32.mrf.mxu0  ;;  %v2879_v59 = vpop.f32.mrf.mxu1 }
 0x57d   :  { %v2927_v57 = vpack.c.bf16 %v2923_v32, %v2923_v32 }
 0x57f   :  { %3224 = vmatprep.mubr.bf16.mxu1 %v2927_v57 }
 0x580   :  { %3225 = vmatmul.mubr.bf16.vlgmr.msra.gmra.mxu1 %v2926_v63 }
 0x581   :  { %4120 = vmatpush3.bf16.msra.mxu1 %v4357_v37  ;;  %3567 = vmatprep.mubr.bf16.mxu1 %v2927_v57 }
 0x582   :  { %4121 = vmatprep.subr.bf16.mxu1 %v4358_v1 }
 0x585   :  { %4122 = vmatpush3.bf16.msra.mxu1 %v4359_v4 }
 0x586   :  { %4123 = vmatprep.subr.bf16.mxu1 %v4360_v34 }
 0x589   :  { %4124 = vmatpush3.bf16.msra.mxu1 %v4361_v35 }
 0x58a   :  { %4125 = vmatprep.subr.bf16.mxu1 %v4362_v38 }
 0x58d   :  { %4126 = vmatpush3.bf16.msra.mxu1 %v4363_v40 }
 0x58e   :  { %4127 = vmatprep.subr.bf16.mxu1 %v4364_v41 }
 0x591   :  { %4128 = vmatpush3.bf16.msra.mxu1 %v4365_v42 }
 0x592   :  { %4129 = vmatprep.subr.bf16.mxu1 %v4366_v43 }
 0x595   :  { %4130 = vmatpush3.bf16.msra.mxu1 %v4367_v44 }
 0x596   :  { %4131 = vmatprep.subr.bf16.mxu1 %v4368_v45 }
 0x599   :  { %4132 = vmatpush3.bf16.msra.mxu1 %v4369_v46 }
 0x59a   :  { %4133 = vmatprep.subr.bf16.mxu1 %v4370_v47 }
 0x59d   :  { %4134 = vmatpush3.bf16.msra.mxu1 %v4371_v48 }
 0x5a0   :  { %3568 = vmatmul.mubr.bf16.vlgmr.msra.gmra.mxu1 %v2926_v63 }
 0x5b6   :  { %v2915_v54 = vpop.f32.mrf.mxu0 }
 0x5b7   :  { %v2916_v18 = vadd.f32 %v2915_v54, %v2875_v51 }
 0x5b8   :  { %v2917_v55 = vpop.f32.mrf.mxu0 }
 0x5b9   :  { %v2918_v52 = vadd.f32 %v2917_v55, %v2877_v53  ;;  %v2924_v56 = vmax.f32 %v2916_v18, 0.0 }
 0x5ba   :  { %v2919_v58 = vpop.f32.mrf.mxu0 }
 0x5bb   :  { %v2925_v36 = vmax.f32 %v2918_v52, 0.0  ;;  %v2928_v62 = vpack.c.bf16 %v2924_v56, %v2924_v56 }
 0x5bc   :  { %v2920_v60 = vpop.f32.mrf.mxu0 }
 0x5bd   :  { %v2929_v39 = vpack.c.bf16 %v2925_v36, %v2925_v36 }
 0x5bf   :  { %3264 = vmatprep.mubr.bf16.mxu0 %v2929_v39 }
 0x5c0   :  { %3265 = vmatmul.mubr.bf16.vlgmr.msra.gmra.mxu0 %v2928_v62 }
 0x5c1   :  { %4142 = vmatpush3.bf16.msra.mxu0 %v4389_v61  ;;  %3607 = vmatprep.mubr.bf16.mxu0 %v2929_v39 }
 0x5c2   :  { %4143 = vmatprep.subr.bf16.mxu0 %v4390_v0 }
 0x5c5   :  { %4144 = vmatpush3.bf16.msra.mxu0 %v4391_v2 }
 0x5c6   :  { %4145 = vmatprep.subr.bf16.mxu0 %v4392_v5 }
 0x5c9   :  { %4146 = vmatpush3.bf16.msra.mxu0 %v4393_v3 }
 0x5ca   :  { %4147 = vmatprep.subr.bf16.mxu0 %v4394_v6 }
 0x5cd   :  { %4148 = vmatpush3.bf16.msra.mxu0 %v4395_v7 }
 0x5ce   :  { %4149 = vmatprep.subr.bf16.mxu0 %v4396_v8 }
 0x5d1   :  { %4150 = vmatpush3.bf16.msra.mxu0 %v4397_v9 }
 0x5d2   :  { %4151 = vmatprep.subr.bf16.mxu0 %v4398_v10 }
 0x5d5   :  { %4152 = vmatpush3.bf16.msra.mxu0 %v4399_v11 }
 0x5d6   :  { %4153 = vmatprep.subr.bf16.mxu0 %v4400_v12 }
 0x5d9   :  { %4154 = vmatpush3.bf16.msra.mxu0 %v4401_v13 }
 0x5da   :  { %4155 = vmatprep.subr.bf16.mxu0 %v4402_v14 }
 0x5dd   :  { %4156 = vmatpush3.bf16.msra.mxu0 %v4403_v15 }
 0x5e0   :  { %3608 = vmatmul.mubr.bf16.vlgmr.msra.gmra.mxu0 %v2928_v62 }
 0x640   :  { %v4091_v16 = vpop.f32.mrf.mxu1 }
 0x642   :  { %v4092_v17 = vpop.f32.mrf.mxu1 }
 0x643   :  { %v4093_v25 = vadd.f32 %v4092_v17, %v4091_v16 }
 0x644   :  { %v4094_v19 = vpop.f32.mrf.mxu1 }
 0x645   :  { %v3227_v29 = vadd.f32 %v4093_v25, %v3989_v26 }
 0x646   :  { %v4095_v20 = vpop.f32.mrf.mxu1 }
 0x660   :  { %v4135_v21 = vpop.f32.mrf.mxu1 }
 0x662   :  { %v4136_v22 = vpop.f32.mrf.mxu1 }
 0x664   :  { %v4138_v23 = vpop.f32.mrf.mxu1 }
 0x666   :  { %v4139_v24 = vpop.f32.mrf.mxu1 }
 0x680   :  { %v4113_v27 = vpop.f32.mrf.mxu0 }
 0x682   :  { %v4114_v28 = vpop.f32.mrf.mxu0 }
 0x683   :  { %v4115_v30 = vadd.f32 %v4114_v28, %v4113_v27 }
 0x684   :  { %v4116_v31 = vpop.f32.mrf.mxu0 }
 0x685   :  { %v3267_v32 = vadd.f32 %v4115_v30, %v3227_v29 }
 0x686   :  { %v4117_v33 = vpop.f32.mrf.mxu0 }
 0x687   :  { %3272 = vst [vmem:[#allocation16] sm:$0xff] %v3267_v32 }
 0x688   :  { %4575 = shalt.err (!%p4572_p2)
}
 0x689   :  { %3625 = dma.vmem_to_hbm [thread:$0]  %s3623_s7, 128, %s4834_s8, [#allocation4]   ;;  %v4137_v59 = vadd.f32 %v4136_v22, %v4135_v21  ;;  %v4022_v57 = vld [vmem:[#allocation14 + $0x10] ss:$0 sm:$0xff] }
 0x68a   :  { %s4636_s30 = smov [#allocation17]  }
 0x68b   :  { %s3632_s10 = sshll.u32 %s4636_s30, 4  ;;  %v3570_v1 = vadd.f32 %v4137_v59, %v4022_v57  ;;  %s3633_s10 = int_to_ptr.vmem [resolvable:$true] %s3632_s10 }
 0x68c   :  { %s4584_s11 = scalar_lea.vmem %s3633_s10, 128  ;;  %p4589_p4 = scmp.lt.s32.totalorder %s3633_s10, %s3633_s10 }
 0x68d   :  { %p4585_p3 = scmp.ne.s32.totalorder %s3633_s10, %s4584_s11  ;;  %p4590_p5 = scmp.lt.s32.totalorder %s4584_s11, %s4584_s11 }
 0x68f   :  { %p4591_p6 = por %p4590_p5, %p4589_p4 }
 0x691   :  { %p4592_p7 = pnand %p4591_p6, %p4585_p3 }
 0x6a0   :  { %v4157_v37 = vpop.f32.mrf.mxu0 }
 0x6a2   :  { %v4158_v63 = vpop.f32.mrf.mxu0 }
 0x6a3   :  { %v4159_v4 = vadd.f32 %v4158_v63, %v4157_v37 }
 0x6a4   :  { %v4160_v34 = vpop.f32.mrf.mxu0 }
 0x6a5   :  { %v3610_v35 = vadd.f32 %v4159_v4, %v3570_v1 }
 0x6a6   :  { %v4161_v38 = vpop.f32.mrf.mxu0 }
 0x6a7   :  { %3615 = vst [vmem:[#allocation17] sm:$0xff] %v3610_v35 }
 0x6a8   :  { %4595 = shalt.err (!%p4592_p7)
}
 0x6a9   :  { %3635 = dma.vmem_to_hbm [thread:$0]  %s3633_s10, 128, %s4835_s9, [#allocation18]  }
 0x6aa   :  { %4614 = dma.done.wait [#allocation4], 128  }
 0x6ab   :  { %4615 = vsyncadd [#allocation4], 4294967168 }
 0x6ac   :  { %4616 = dma.done.wait [#allocation18], 128  }
 0x6ad   :  { %4617 = vsyncadd [#allocation18], 4294967168 }
 0x6ae   :  { %3642 = vsyncpa [#allocation3], 1 }
 0x6af   :  { %3643 = vsyncpa [#allocation6], 1 }
 0x6b0   :  { %3644 = vsyncpa [#allocation9], 1 }
 0x6b1   :  { %3645 = vsyncpa [#allocation12], 1 }
 0x6b2   :  { %3646 = vsyncpa [#allocation15], 1 }
 0x6b3   :  { %3647 = vsyncpa [#allocation4], 1 }
 0x6b4   :  { %3648 = vsyncpa [#allocation18], 1 }

</bundles_post_ra>
